<compile_context>
chip_gen: v7x
topology: tpu7x:2x2x1
jax: 0.10.0
libtpu: 0.0.40
codegen_flags: <defaults>
</compile_context>

<pallas_src>
import jax
import jax.numpy as jnp
import numpy as np
from jax.experimental import pallas as pl
from jax.experimental.pallas import tpu as pltpu

# ---- "config" (small, deterministic, consistent with the module) ------------
INPUT_CHANNEL    = 68     # fixed in the module
NUM_CONV_FILTERS = 32
OUTPUT_CHANNEL   = 64
NUM_AFFINE       = 32
TARGET_CLASS     = 4
REGRESSION       = False
SEQ_LEN          = 128    # smallest convenient length that survives the conv/pool chain
BATCH            = 2
# TODO(synk): nn.Dropout is inference-mode identity here; training-mode dropout
# would use pltpu.prng_seed / pltpu.prng_random_bits inside the kernel.


# ----------------------------- Pallas kernel ---------------------------------
def charcnn_kernel(x_ref, w1_ref, wstk_ref, fcw_ref, b_ref, out_ref, buf):
    f32 = jnp.float32
    F = NUM_CONV_FILTERS
    O = OUTPUT_CHANNEL
    A = NUM_AFFINE

    def bias(row, width):
        return b_ref[row:row + 1, 0:width]                 # (1, width)

    def conv_roll(x, K, tap_w, L_out):
        # x: (L_in, C_in) value (L_in multiple of 8); tap_w(k) -> (C_in, C_out).
        # Full-length aligned matmul per tap; shift the narrow output on the XLU.
        L_in = x.shape[0]
        acc = jnp.dot(x, tap_w(0), preferred_element_type=f32)
        for k in range(1, K):
            yk = jnp.dot(x, tap_w(k), preferred_element_type=f32)
            acc = acc + pltpu.roll(yk, shift=L_in - k, axis=0)   # == shift rows up by k
        return acc[0:L_out, :]

    def conv_slice(h, K, tap_w):
        # Tail convs: inputs are <= 11 rows x 32 lanes (1-2 vregs); value slices
        # are trivially cheap, keep everything in registers.
        L_out = h.shape[0] - K + 1
        acc = jnp.dot(h[0:L_out, :], tap_w(0), preferred_element_type=f32)
        for k in range(1, K):
            acc = acc + jnp.dot(h[k:k + L_out, :], tap_w(k),
                                preferred_element_type=f32)
        return acc

    def pool3(src_len, width):
        # max_pool1d(kernel=3, stride=3): max of three stride-3 row reads.
        n = (src_len - 3) // 3 + 1
        p = buf[pl.ds(0, n, stride=3), 0:width]
        p = jnp.maximum(p, buf[pl.ds(1, n, stride=3), 0:width])
        p = jnp.maximum(p, buf[pl.ds(2, n, stride=3), 0:width])
        return p

    # ---- conv1 (k=7, 68->32) + relu + maxpool3 --------------------------------
    x = x_ref[0]                                   # (L, 68); no staging copy
    L = x.shape[0]
    L1 = L - 6
    y = conv_roll(x, 7, lambda k: w1_ref[k], L1)
    y = jnp.maximum(y + bias(0, F), 0.0)
    buf[0:L1, 0:F] = y
    h = pool3(L1, F)                               # (n1, 32)

    # ---- conv2 (k=7, 32->32) + relu + maxpool3 --------------------------------
    L2 = h.shape[0] - 6
    y = conv_roll(h, 7, lambda k: wstk_ref[k][:, 0:F], L2)
    y = jnp.maximum(y + bias(1, F), 0.0)
    buf[0:L2, 0:F] = y
    h = pool3(L2, F)                               # (n2, 32)

    # ---- conv3..conv5 (k=3, 32->32) + relu, all in registers ------------------
    for i, base in enumerate((7, 10, 13)):
        h = conv_slice(h, 3, lambda k, _b=base: wstk_ref[_b + k][:, 0:F])
        h = jnp.maximum(h + bias(2 + i, F), 0.0)

    # ---- conv6 (k=3, 32->64) + relu + global max pool over time ---------------
    h = conv_slice(h, 3, lambda k: wstk_ref[16 + k])
    h = jnp.maximum(h + bias(5, O), 0.0)
    g = jnp.max(h, axis=0, keepdims=True)          # (1, 64)

    # ---- fc1 -> relu -> (dropout: id) -> fc2 -> relu -> (dropout) -> fc3 ------
    h = jnp.maximum(jnp.dot(g, fcw_ref[0:O, 0:A], preferred_element_type=f32)
                    + bias(6, A), 0.0)
    h = jnp.maximum(jnp.dot(h, fcw_ref[O:O + A, 0:A], preferred_element_type=f32)
                    + bias(7, A), 0.0)
    T = out_ref.shape[2]
    o = jnp.dot(h, fcw_ref[O + A:O + 2 * A, 0:T], preferred_element_type=f32) + bias(8, T)
    if REGRESSION:
        o = jnp.tanh(o)
    out_ref[0] = o.astype(out_ref.dtype)


# ------------------------------ wrapper ---------------------------------------
def pack_params(p):
    """Pack the 18 tiny parameter arrays into 4 operands (layout plumbing only)."""
    F, O, A = NUM_CONV_FILTERS, OUTPUT_CHANNEL, NUM_AFFINE
    T = p["fw3"].shape[1]

    # conv2..conv6 taps stacked on the tap axis, out-lanes zero-padded to 64:
    #   rows 0..6 = w2, 7..9 = w3, 10..12 = w4, 13..15 = w5, 16..18 = w6
    def pad_out(w):
        return jnp.pad(w, ((0, 0), (0, 0), (0, O - w.shape[2])))
    wstk = jnp.concatenate([pad_out(p["w2"]), pad_out(p["w3"]), pad_out(p["w4"]),
                            pad_out(p["w5"]), p["w6"]], axis=0)          # (19, 32, 64)

    # FC weights packed row-wise: rows 0:64 = fw1, 64:96 = fw2, 96:128 = fw3 (lanes 0:T).
    fcw = jnp.zeros((O + 2 * A, A), jnp.float32)
    fcw = fcw.at[0:O, 0:A].set(p["fw1"])
    fcw = fcw.at[O:O + A, 0:A].set(p["fw2"])
    fcw = fcw.at[O + A:O + 2 * A, 0:T].set(p["fw3"])

    # All 9 biases as rows of one (9, 64) slab.
    bias = jnp.zeros((9, O), jnp.float32)
    for r, (name, width) in enumerate([("b1", F), ("b2", F), ("b3", F), ("b4", F),
                                       ("b5", F), ("b6", O), ("fb1", A), ("fb2", A),
                                       ("fb3", T)]):
        bias = bias.at[r, 0:width].set(p[name][0])
    return p["w1"], wstk, fcw, bias


def charcnn_forward(x, params):
    B, L, Cin = x.shape
    T = params["fw3"].shape[1]
    w1, wstk, fcw, bias = pack_params(params)

    def full_spec(a):
        r = a.ndim
        return pl.BlockSpec(a.shape, lambda b, _r=r: (0,) * _r)

    out = pl.pallas_call(
        charcnn_kernel,
        out_shape=jax.ShapeDtypeStruct((B, 1, T), jnp.float32),
        grid_spec=pltpu.PrefetchScalarGridSpec(
            num_scalar_prefetch=0,
            grid=(B,),
            in_specs=[pl.BlockSpec((1, L, Cin), lambda b: (b, 0, 0)),
                      full_spec(w1), full_spec(wstk), full_spec(fcw), full_spec(bias)],
            out_specs=pl.BlockSpec((1, 1, T), lambda b: (b, 0, 0)),
            # single scratch buffer, used only for the two strided-read pools
            scratch_shapes=[pltpu.VMEM((max(L, 128), NUM_CONV_FILTERS), jnp.float32)],
        ),
        compiler_params=pltpu.CompilerParams(dimension_semantics=("parallel",)),
    )(x, w1, wstk, fcw, bias)
    return out[:, 0, :]


# --------------------------- params / reference --------------------------------
def init_params(key):
    ks = jax.random.split(key, 18)
    F, O, A, T, C = (NUM_CONV_FILTERS, OUTPUT_CHANNEL, NUM_AFFINE, TARGET_CLASS,
                     INPUT_CHANNEL)

    def w(k, shape, scale=0.05):
        return (scale * jax.random.normal(k, shape)).astype(jnp.float32)

    p = {}
    p["w1"], p["b1"] = w(ks[0], (7, C, F)), w(ks[1], (1, F))
    p["w2"], p["b2"] = w(ks[2], (7, F, F)), w(ks[3], (1, F))
    p["w3"], p["b3"] = w(ks[4], (3, F, F)), w(ks[5], (1, F))
    p["w4"], p["b4"] = w(ks[6], (3, F, F)), w(ks[7], (1, F))
    p["w5"], p["b5"] = w(ks[8], (3, F, F)), w(ks[9], (1, F))
    p["w6"], p["b6"] = w(ks[10], (3, F, O)), w(ks[11], (1, O))
    p["fw1"], p["fb1"] = w(ks[12], (O, A)), w(ks[13], (1, A))
    p["fw2"], p["fb2"] = w(ks[14], (A, A)), w(ks[15], (1, A))
    out_dim = 1 if REGRESSION else T
    p["fw3"], p["fb3"] = w(ks[16], (A, out_dim)), w(ks[17], (1, out_dim))
    return p


def ref_forward(x, p):
    # Plain-JAX reference with identical math (eval mode: dropout = identity).
    def conv_relu(h, w, b):
        K, _, Co = w.shape
        Lout = h.shape[1] - K + 1
        acc = jnp.zeros((h.shape[0], Lout, Co), jnp.float32)
        for k in range(K):
            acc = acc + jnp.einsum("blc,co->blo", h[:, k:k + Lout, :], w[k])
        return jax.nn.relu(acc + b)

    def pool3(h):
        n = h.shape[1] // 3
        return jnp.max(h[:, :3 * n, :].reshape(h.shape[0], n, 3, h.shape[2]), axis=2)

    h = pool3(conv_relu(x, p["w1"], p["b1"]))
    h = pool3(conv_relu(h, p["w2"], p["b2"]))
    h = conv_relu(h, p["w3"], p["b3"])
    h = conv_relu(h, p["w4"], p["b4"])
    h = conv_relu(h, p["w5"], p["b5"])
    h = conv_relu(h, p["w6"], p["b6"])
    g = jnp.max(h, axis=1)                                 # global max pool over time
    h1 = jax.nn.relu(g @ p["fw1"] + p["fb1"])
    h2 = jax.nn.relu(h1 @ p["fw2"] + p["fb2"])
    o = h2 @ p["fw3"] + p["fb3"]
    return jnp.tanh(o) if REGRESSION else o


if __name__ == "__main__":
    key = jax.random.PRNGKey(0)
    kx, kp = jax.random.split(key)
    # Module input is (batch, seq_len, 68); the forward transposes to NCL itself.
    x = jax.random.normal(kx, (BATCH, SEQ_LEN, INPUT_CHANNEL), dtype=jnp.float32)
    params = init_params(kp)

    out = jax.block_until_ready(charcnn_forward(x, params))

    ref = ref_forward(x, params)
    np.testing.assert_allclose(np.asarray(out), np.asarray(ref), rtol=1e-4, atol=1e-4)
    print("KERNEL_OK")
</pallas_src>

<mosaic_0001>
module attributes {stable_mosaic.version = 11 : i64} {
  func.func @charcnn_kernel(%arg0: i32, %arg1: memref<1x128x68xf32, #tpu.memory_space<vmem>>, %arg2: memref<7x68x32xf32, #tpu.memory_space<vmem>>, %arg3: memref<19x32x64xf32, #tpu.memory_space<vmem>>, %arg4: memref<128x32xf32, #tpu.memory_space<vmem>>, %arg5: memref<9x64xf32, #tpu.memory_space<vmem>>, %arg6: memref<1x1x4xf32, #tpu.memory_space<vmem>>, %arg7: memref<128x32xf32, #tpu.memory_space<vmem>>) attributes {dimension_semantics = [#tpu.dimension_semantics<parallel>], iteration_bounds = array<i64: 2>, scalar_prefetch = 0 : i64, scratch_operands = 1 : i64, tpu.core_type = #tpu.core_type<tc>, window_params = [{transform_indices = @transform_0, window_bounds = array<i64: 1, 128, 68>}, {pipeline_mode = #tpu.pipeline_mode<synchronous>, transform_indices = @transform_1, window_bounds = array<i64: 7, 68, 32>}, {pipeline_mode = #tpu.pipeline_mode<synchronous>, transform_indices = @transform_2, window_bounds = array<i64: 19, 32, 64>}, {pipeline_mode = #tpu.pipeline_mode<synchronous>, transform_indices = @transform_3, window_bounds = array<i64: 128, 32>}, {pipeline_mode = #tpu.pipeline_mode<synchronous>, transform_indices = @transform_4, window_bounds = array<i64: 9, 64>}, {transform_indices = @transform_5, window_bounds = array<i64: 1, 1, 4>}]} {
    %c0 = arith.constant 0 : index
    %c0_0 = arith.constant 0 : index
    %c0_1 = arith.constant 0 : index
    %0 = vector.load %arg1[%c0, %c0_0, %c0_1] : memref<1x128x68xf32, #tpu.memory_space<vmem>>, vector<1x128x68xf32>
    %1 = vector.shape_cast %0 : vector<1x128x68xf32> to vector<128x68xf32>
    %c0_2 = arith.constant 0 : index
    %c0_3 = arith.constant 0 : index
    %c0_4 = arith.constant 0 : index
    %2 = vector.load %arg2[%c0_2, %c0_3, %c0_4] : memref<7x68x32xf32, #tpu.memory_space<vmem>>, vector<1x68x32xf32>
    %3 = vector.shape_cast %2 : vector<1x68x32xf32> to vector<68x32xf32>
    %cst = arith.constant dense<0.000000e+00> : vector<128x32xf32>
    %4 = tpu.matmul %1, %3, %cst {dimension_numbers = #tpu.dot_dimension_numbers<[1], [0], [0], [1], [0, 0, 1, 1], [], []>} : vector<128x68xf32>, vector<68x32xf32>, vector<128x32xf32> -> vector<128x32xf32>
    %c1 = arith.constant 1 : index
    %c0_5 = arith.constant 0 : index
    %c0_6 = arith.constant 0 : index
    %5 = vector.load %arg2[%c1, %c0_5, %c0_6] : memref<7x68x32xf32, #tpu.memory_space<vmem>>, vector<1x68x32xf32>
    %6 = vector.shape_cast %5 : vector<1x68x32xf32> to vector<68x32xf32>
    %cst_7 = arith.constant dense<0.000000e+00> : vector<128x32xf32>
    %7 = tpu.matmul %1, %6, %cst_7 {dimension_numbers = #tpu.dot_dimension_numbers<[1], [0], [0], [1], [0, 0, 1, 1], [], []>} : vector<128x68xf32>, vector<68x32xf32>, vector<128x32xf32> -> vector<128x32xf32>
    %c127_i32 = arith.constant 127 : i32
    %8 = tpu.dynamic_rotate %7 by %c127_i32 dim 0 : vector<128x32xf32>, i32 -> vector<128x32xf32>
    %9 = arith.addf %4, %8 : vector<128x32xf32>
    %c2 = arith.constant 2 : index
    %c0_8 = arith.constant 0 : index
    %c0_9 = arith.constant 0 : index
    %10 = vector.load %arg2[%c2, %c0_8, %c0_9] : memref<7x68x32xf32, #tpu.memory_space<vmem>>, vector<1x68x32xf32>
    %11 = vector.shape_cast %10 : vector<1x68x32xf32> to vector<68x32xf32>
    %cst_10 = arith.constant dense<0.000000e+00> : vector<128x32xf32>
    %12 = tpu.matmul %1, %11, %cst_10 {dimension_numbers = #tpu.dot_dimension_numbers<[1], [0], [0], [1], [0, 0, 1, 1], [], []>} : vector<128x68xf32>, vector<68x32xf32>, vector<128x32xf32> -> vector<128x32xf32>
    %c126_i32 = arith.constant 126 : i32
    %13 = tpu.dynamic_rotate %12 by %c126_i32 dim 0 : vector<128x32xf32>, i32 -> vector<128x32xf32>
    %14 = arith.addf %9, %13 : vector<128x32xf32>
    %c3 = arith.constant 3 : index
    %c0_11 = arith.constant 0 : index
    %c0_12 = arith.constant 0 : index
    %15 = vector.load %arg2[%c3, %c0_11, %c0_12] : memref<7x68x32xf32, #tpu.memory_space<vmem>>, vector<1x68x32xf32>
    %16 = vector.shape_cast %15 : vector<1x68x32xf32> to vector<68x32xf32>
    %cst_13 = arith.constant dense<0.000000e+00> : vector<128x32xf32>
    %17 = tpu.matmul %1, %16, %cst_13 {dimension_numbers = #tpu.dot_dimension_numbers<[1], [0], [0], [1], [0, 0, 1, 1], [], []>} : vector<128x68xf32>, vector<68x32xf32>, vector<128x32xf32> -> vector<128x32xf32>
    %c125_i32 = arith.constant 125 : i32
    %18 = tpu.dynamic_rotate %17 by %c125_i32 dim 0 : vector<128x32xf32>, i32 -> vector<128x32xf32>
    %19 = arith.addf %14, %18 : vector<128x32xf32>
    %c4 = arith.constant 4 : index
    %c0_14 = arith.constant 0 : index
    %c0_15 = arith.constant 0 : index
    %20 = vector.load %arg2[%c4, %c0_14, %c0_15] : memref<7x68x32xf32, #tpu.memory_space<vmem>>, vector<1x68x32xf32>
    %21 = vector.shape_cast %20 : vector<1x68x32xf32> to vector<68x32xf32>
    %cst_16 = arith.constant dense<0.000000e+00> : vector<128x32xf32>
    %22 = tpu.matmul %1, %21, %cst_16 {dimension_numbers = #tpu.dot_dimension_numbers<[1], [0], [0], [1], [0, 0, 1, 1], [], []>} : vector<128x68xf32>, vector<68x32xf32>, vector<128x32xf32> -> vector<128x32xf32>
    %c124_i32 = arith.constant 124 : i32
    %23 = tpu.dynamic_rotate %22 by %c124_i32 dim 0 : vector<128x32xf32>, i32 -> vector<128x32xf32>
    %24 = arith.addf %19, %23 : vector<128x32xf32>
    %c5 = arith.constant 5 : index
    %c0_17 = arith.constant 0 : index
    %c0_18 = arith.constant 0 : index
    %25 = vector.load %arg2[%c5, %c0_17, %c0_18] : memref<7x68x32xf32, #tpu.memory_space<vmem>>, vector<1x68x32xf32>
    %26 = vector.shape_cast %25 : vector<1x68x32xf32> to vector<68x32xf32>
    %cst_19 = arith.constant dense<0.000000e+00> : vector<128x32xf32>
    %27 = tpu.matmul %1, %26, %cst_19 {dimension_numbers = #tpu.dot_dimension_numbers<[1], [0], [0], [1], [0, 0, 1, 1], [], []>} : vector<128x68xf32>, vector<68x32xf32>, vector<128x32xf32> -> vector<128x32xf32>
    %c123_i32 = arith.constant 123 : i32
    %28 = tpu.dynamic_rotate %27 by %c123_i32 dim 0 : vector<128x32xf32>, i32 -> vector<128x32xf32>
    %29 = arith.addf %24, %28 : vector<128x32xf32>
    %c6 = arith.constant 6 : index
    %c0_20 = arith.constant 0 : index
    %c0_21 = arith.constant 0 : index
    %30 = vector.load %arg2[%c6, %c0_20, %c0_21] : memref<7x68x32xf32, #tpu.memory_space<vmem>>, vector<1x68x32xf32>
    %31 = vector.shape_cast %30 : vector<1x68x32xf32> to vector<68x32xf32>
    %cst_22 = arith.constant dense<0.000000e+00> : vector<128x32xf32>
    %32 = tpu.matmul %1, %31, %cst_22 {dimension_numbers = #tpu.dot_dimension_numbers<[1], [0], [0], [1], [0, 0, 1, 1], [], []>} : vector<128x68xf32>, vector<68x32xf32>, vector<128x32xf32> -> vector<128x32xf32>
    %c122_i32 = arith.constant 122 : i32
    %33 = tpu.dynamic_rotate %32 by %c122_i32 dim 0 : vector<128x32xf32>, i32 -> vector<128x32xf32>
    %34 = arith.addf %29, %33 : vector<128x32xf32>
    %35 = vector.extract_strided_slice %34 {offsets = [0, 0], sizes = [122, 32], strides = [1, 1]} : vector<128x32xf32> to vector<122x32xf32>
    %c0_23 = arith.constant 0 : index
    %c0_24 = arith.constant 0 : index
    %36 = vector.load %arg5[%c0_23, %c0_24] : memref<9x64xf32, #tpu.memory_space<vmem>>, vector<1x32xf32>
    %37 = vector.broadcast %36 : vector<1x32xf32> to vector<122x32xf32>
    %38 = arith.addf %35, %37 : vector<122x32xf32>
    %cst_25 = arith.constant 0.000000e+00 : f32
    %39 = vector.broadcast %cst_25 : f32 to vector<122x32xf32>
    %40 = arith.maximumf %38, %39 : vector<122x32xf32>
    %c0_26 = arith.constant 0 : index
    %c0_27 = arith.constant 0 : index
    %41 = vector.load %arg7[%c0_26, %c0_27] : memref<128x32xf32, #tpu.memory_space<vmem>>, vector<122x32xf32>
    tpu.vector_store %arg7[%c0_26, %c0_27], %40 {strides = array<i32>} : memref<128x32xf32, #tpu.memory_space<vmem>>, vector<122x32xf32>,
    %c0_28 = arith.constant 0 : index
    %c0_29 = arith.constant 0 : index
    %42 = tpu.strided_load %arg7[%c0_28, %c0_29] {strides = array<i32: 3, 1>} : memref<128x32xf32, #tpu.memory_space<vmem>>, vector<40x32xf32>
    %c1_30 = arith.constant 1 : index
    %c0_31 = arith.constant 0 : index
    %43 = tpu.strided_load %arg7[%c1_30, %c0_31] {strides = array<i32: 3, 1>} : memref<128x32xf32, #tpu.memory_space<vmem>>, vector<40x32xf32>
    %44 = arith.maximumf %42, %43 : vector<40x32xf32>
    %c2_32 = arith.constant 2 : index
    %c0_33 = arith.constant 0 : index
    %45 = tpu.strided_load %arg7[%c2_32, %c0_33] {strides = array<i32: 3, 1>} : memref<128x32xf32, #tpu.memory_space<vmem>>, vector<40x32xf32>
    %46 = arith.maximumf %44, %45 : vector<40x32xf32>
    %c0_34 = arith.constant 0 : index
    %c0_35 = arith.constant 0 : index
    %c0_36 = arith.constant 0 : index
    %47 = vector.load %arg3[%c0_34, %c0_35, %c0_36] : memref<19x32x64xf32, #tpu.memory_space<vmem>>, vector<1x32x64xf32>
    %48 = vector.shape_cast %47 : vector<1x32x64xf32> to vector<32x64xf32>
    %49 = vector.extract_strided_slice %48 {offsets = [0, 0], sizes = [32, 32], strides = [1, 1]} : vector<32x64xf32> to vector<32x32xf32>
    %cst_37 = arith.constant dense<0.000000e+00> : vector<40x32xf32>
    %50 = tpu.matmul %46, %49, %cst_37 {dimension_numbers = #tpu.dot_dimension_numbers<[1], [0], [0], [1], [0, 0, 1, 1], [], []>} : vector<40x32xf32>, vector<32x32xf32>, vector<40x32xf32> -> vector<40x32xf32>
    %c1_38 = arith.constant 1 : index
    %c0_39 = arith.constant 0 : index
    %c0_40 = arith.constant 0 : index
    %51 = vector.load %arg3[%c1_38, %c0_39, %c0_40] : memref<19x32x64xf32, #tpu.memory_space<vmem>>, vector<1x32x64xf32>
    %52 = vector.shape_cast %51 : vector<1x32x64xf32> to vector<32x64xf32>
    %53 = vector.extract_strided_slice %52 {offsets = [0, 0], sizes = [32, 32], strides = [1, 1]} : vector<32x64xf32> to vector<32x32xf32>
    %cst_41 = arith.constant dense<0.000000e+00> : vector<40x32xf32>
    %54 = tpu.matmul %46, %53, %cst_41 {dimension_numbers = #tpu.dot_dimension_numbers<[1], [0], [0], [1], [0, 0, 1, 1], [], []>} : vector<40x32xf32>, vector<32x32xf32>, vector<40x32xf32> -> vector<40x32xf32>
    %c39_i32 = arith.constant 39 : i32
    %55 = tpu.dynamic_rotate %54 by %c39_i32 dim 0 : vector<40x32xf32>, i32 -> vector<40x32xf32>
    %56 = arith.addf %50, %55 : vector<40x32xf32>
    %c2_42 = arith.constant 2 : index
    %c0_43 = arith.constant 0 : index
    %c0_44 = arith.constant 0 : index
    %57 = vector.load %arg3[%c2_42, %c0_43, %c0_44] : memref<19x32x64xf32, #tpu.memory_space<vmem>>, vector<1x32x64xf32>
    %58 = vector.shape_cast %57 : vector<1x32x64xf32> to vector<32x64xf32>
    %59 = vector.extract_strided_slice %58 {offsets = [0, 0], sizes = [32, 32], strides = [1, 1]} : vector<32x64xf32> to vector<32x32xf32>
    %cst_45 = arith.constant dense<0.000000e+00> : vector<40x32xf32>
    %60 = tpu.matmul %46, %59, %cst_45 {dimension_numbers = #tpu.dot_dimension_numbers<[1], [0], [0], [1], [0, 0, 1, 1], [], []>} : vector<40x32xf32>, vector<32x32xf32>, vector<40x32xf32> -> vector<40x32xf32>
    %c38_i32 = arith.constant 38 : i32
    %61 = tpu.dynamic_rotate %60 by %c38_i32 dim 0 : vector<40x32xf32>, i32 -> vector<40x32xf32>
    %62 = arith.addf %56, %61 : vector<40x32xf32>
    %c3_46 = arith.constant 3 : index
    %c0_47 = arith.constant 0 : index
    %c0_48 = arith.constant 0 : index
    %63 = vector.load %arg3[%c3_46, %c0_47, %c0_48] : memref<19x32x64xf32, #tpu.memory_space<vmem>>, vector<1x32x64xf32>
    %64 = vector.shape_cast %63 : vector<1x32x64xf32> to vector<32x64xf32>
    %65 = vector.extract_strided_slice %64 {offsets = [0, 0], sizes = [32, 32], strides = [1, 1]} : vector<32x64xf32> to vector<32x32xf32>
    %cst_49 = arith.constant dense<0.000000e+00> : vector<40x32xf32>
    %66 = tpu.matmul %46, %65, %cst_49 {dimension_numbers = #tpu.dot_dimension_numbers<[1], [0], [0], [1], [0, 0, 1, 1], [], []>} : vector<40x32xf32>, vector<32x32xf32>, vector<40x32xf32> -> vector<40x32xf32>
    %c37_i32 = arith.constant 37 : i32
    %67 = tpu.dynamic_rotate %66 by %c37_i32 dim 0 : vector<40x32xf32>, i32 -> vector<40x32xf32>
    %68 = arith.addf %62, %67 : vector<40x32xf32>
    %c4_50 = arith.constant 4 : index
    %c0_51 = arith.constant 0 : index
    %c0_52 = arith.constant 0 : index
    %69 = vector.load %arg3[%c4_50, %c0_51, %c0_52] : memref<19x32x64xf32, #tpu.memory_space<vmem>>, vector<1x32x64xf32>
    %70 = vector.shape_cast %69 : vector<1x32x64xf32> to vector<32x64xf32>
    %71 = vector.extract_strided_slice %70 {offsets = [0, 0], sizes = [32, 32], strides = [1, 1]} : vector<32x64xf32> to vector<32x32xf32>
    %cst_53 = arith.constant dense<0.000000e+00> : vector<40x32xf32>
    %72 = tpu.matmul %46, %71, %cst_53 {dimension_numbers = #tpu.dot_dimension_numbers<[1], [0], [0], [1], [0, 0, 1, 1], [], []>} : vector<40x32xf32>, vector<32x32xf32>, vector<40x32xf32> -> vector<40x32xf32>
    %c36_i32 = arith.constant 36 : i32
    %73 = tpu.dynamic_rotate %72 by %c36_i32 dim 0 : vector<40x32xf32>, i32 -> vector<40x32xf32>
    %74 = arith.addf %68, %73 : vector<40x32xf32>
    %c5_54 = arith.constant 5 : index
    %c0_55 = arith.constant 0 : index
    %c0_56 = arith.constant 0 : index
    %75 = vector.load %arg3[%c5_54, %c0_55, %c0_56] : memref<19x32x64xf32, #tpu.memory_space<vmem>>, vector<1x32x64xf32>
    %76 = vector.shape_cast %75 : vector<1x32x64xf32> to vector<32x64xf32>
    %77 = vector.extract_strided_slice %76 {offsets = [0, 0], sizes = [32, 32], strides = [1, 1]} : vector<32x64xf32> to vector<32x32xf32>
    %cst_57 = arith.constant dense<0.000000e+00> : vector<40x32xf32>
    %78 = tpu.matmul %46, %77, %cst_57 {dimension_numbers = #tpu.dot_dimension_numbers<[1], [0], [0], [1], [0, 0, 1, 1], [], []>} : vector<40x32xf32>, vector<32x32xf32>, vector<40x32xf32> -> vector<40x32xf32>
    %c35_i32 = arith.constant 35 : i32
    %79 = tpu.dynamic_rotate %78 by %c35_i32 dim 0 : vector<40x32xf32>, i32 -> vector<40x32xf32>
    %80 = arith.addf %74, %79 : vector<40x32xf32>
    %c6_58 = arith.constant 6 : index
    %c0_59 = arith.constant 0 : index
    %c0_60 = arith.constant 0 : index
    %81 = vector.load %arg3[%c6_58, %c0_59, %c0_60] : memref<19x32x64xf32, #tpu.memory_space<vmem>>, vector<1x32x64xf32>
    %82 = vector.shape_cast %81 : vector<1x32x64xf32> to vector<32x64xf32>
    %83 = vector.extract_strided_slice %82 {offsets = [0, 0], sizes = [32, 32], strides = [1, 1]} : vector<32x64xf32> to vector<32x32xf32>
    %cst_61 = arith.constant dense<0.000000e+00> : vector<40x32xf32>
    %84 = tpu.matmul %46, %83, %cst_61 {dimension_numbers = #tpu.dot_dimension_numbers<[1], [0], [0], [1], [0, 0, 1, 1], [], []>} : vector<40x32xf32>, vector<32x32xf32>, vector<40x32xf32> -> vector<40x32xf32>
    %c34_i32 = arith.constant 34 : i32
    %85 = tpu.dynamic_rotate %84 by %c34_i32 dim 0 : vector<40x32xf32>, i32 -> vector<40x32xf32>
    %86 = arith.addf %80, %85 : vector<40x32xf32>
    %87 = vector.extract_strided_slice %86 {offsets = [0, 0], sizes = [34, 32], strides = [1, 1]} : vector<40x32xf32> to vector<34x32xf32>
    %c1_62 = arith.constant 1 : index
    %c0_63 = arith.constant 0 : index
    %88 = vector.load %arg5[%c1_62, %c0_63] : memref<9x64xf32, #tpu.memory_space<vmem>>, vector<1x32xf32>
    %89 = vector.broadcast %88 : vector<1x32xf32> to vector<34x32xf32>
    %90 = arith.addf %87, %89 : vector<34x32xf32>
    %cst_64 = arith.constant 0.000000e+00 : f32
    %91 = vector.broadcast %cst_64 : f32 to vector<34x32xf32>
    %92 = arith.maximumf %90, %91 : vector<34x32xf32>
    %c0_65 = arith.constant 0 : index
    %c0_66 = arith.constant 0 : index
    %93 = vector.load %arg7[%c0_65, %c0_66] : memref<128x32xf32, #tpu.memory_space<vmem>>, vector<34x32xf32>
    tpu.vector_store %arg7[%c0_65, %c0_66], %92 {strides = array<i32>} : memref<128x32xf32, #tpu.memory_space<vmem>>, vector<34x32xf32>,
    %c0_67 = arith.constant 0 : index
    %c0_68 = arith.constant 0 : index
    %94 = tpu.strided_load %arg7[%c0_67, %c0_68] {strides = array<i32: 3, 1>} : memref<128x32xf32, #tpu.memory_space<vmem>>, vector<11x32xf32>
    %c1_69 = arith.constant 1 : index
    %c0_70 = arith.constant 0 : index
    %95 = tpu.strided_load %arg7[%c1_69, %c0_70] {strides = array<i32: 3, 1>} : memref<128x32xf32, #tpu.memory_space<vmem>>, vector<11x32xf32>
    %96 = arith.maximumf %94, %95 : vector<11x32xf32>
    %c2_71 = arith.constant 2 : index
    %c0_72 = arith.constant 0 : index
    %97 = tpu.strided_load %arg7[%c2_71, %c0_72] {strides = array<i32: 3, 1>} : memref<128x32xf32, #tpu.memory_space<vmem>>, vector<11x32xf32>
    %98 = arith.maximumf %96, %97 : vector<11x32xf32>
    %99 = vector.extract_strided_slice %98 {offsets = [0, 0], sizes = [9, 32], strides = [1, 1]} : vector<11x32xf32> to vector<9x32xf32>
    %c7 = arith.constant 7 : index
    %c0_73 = arith.constant 0 : index
    %c0_74 = arith.constant 0 : index
    %100 = vector.load %arg3[%c7, %c0_73, %c0_74] : memref<19x32x64xf32, #tpu.memory_space<vmem>>, vector<1x32x64xf32>
    %101 = vector.shape_cast %100 : vector<1x32x64xf32> to vector<32x64xf32>
    %102 = vector.extract_strided_slice %101 {offsets = [0, 0], sizes = [32, 32], strides = [1, 1]} : vector<32x64xf32> to vector<32x32xf32>
    %cst_75 = arith.constant dense<0.000000e+00> : vector<9x32xf32>
    %103 = tpu.matmul %99, %102, %cst_75 {dimension_numbers = #tpu.dot_dimension_numbers<[1], [0], [0], [1], [0, 0, 1, 1], [], []>} : vector<9x32xf32>, vector<32x32xf32>, vector<9x32xf32> -> vector<9x32xf32>
    %104 = vector.extract_strided_slice %98 {offsets = [1, 0], sizes = [9, 32], strides = [1, 1]} : vector<11x32xf32> to vector<9x32xf32>
    %c8 = arith.constant 8 : index
    %c0_76 = arith.constant 0 : index
    %c0_77 = arith.constant 0 : index
    %105 = vector.load %arg3[%c8, %c0_76, %c0_77] : memref<19x32x64xf32, #tpu.memory_space<vmem>>, vector<1x32x64xf32>
    %106 = vector.shape_cast %105 : vector<1x32x64xf32> to vector<32x64xf32>
    %107 = vector.extract_strided_slice %106 {offsets = [0, 0], sizes = [32, 32], strides = [1, 1]} : vector<32x64xf32> to vector<32x32xf32>
    %cst_78 = arith.constant dense<0.000000e+00> : vector<9x32xf32>
    %108 = tpu.matmul %104, %107, %cst_78 {dimension_numbers = #tpu.dot_dimension_numbers<[1], [0], [0], [1], [0, 0, 1, 1], [], []>} : vector<9x32xf32>, vector<32x32xf32>, vector<9x32xf32> -> vector<9x32xf32>
    %109 = arith.addf %103, %108 : vector<9x32xf32>
    %110 = vector.extract_strided_slice %98 {offsets = [2, 0], sizes = [9, 32], strides = [1, 1]} : vector<11x32xf32> to vector<9x32xf32>
    %c9 = arith.constant 9 : index
    %c0_79 = arith.constant 0 : index
    %c0_80 = arith.constant 0 : index
    %111 = vector.load %arg3[%c9, %c0_79, %c0_80] : memref<19x32x64xf32, #tpu.memory_space<vmem>>, vector<1x32x64xf32>
    %112 = vector.shape_cast %111 : vector<1x32x64xf32> to vector<32x64xf32>
    %113 = vector.extract_strided_slice %112 {offsets = [0, 0], sizes = [32, 32], strides = [1, 1]} : vector<32x64xf32> to vector<32x32xf32>
    %cst_81 = arith.constant dense<0.000000e+00> : vector<9x32xf32>
    %114 = tpu.matmul %110, %113, %cst_81 {dimension_numbers = #tpu.dot_dimension_numbers<[1], [0], [0], [1], [0, 0, 1, 1], [], []>} : vector<9x32xf32>, vector<32x32xf32>, vector<9x32xf32> -> vector<9x32xf32>
    %115 = arith.addf %109, %114 : vector<9x32xf32>
    %c2_82 = arith.constant 2 : index
    %c0_83 = arith.constant 0 : index
    %116 = vector.load %arg5[%c2_82, %c0_83] : memref<9x64xf32, #tpu.memory_space<vmem>>, vector<1x32xf32>
    %117 = vector.broadcast %116 : vector<1x32xf32> to vector<9x32xf32>
    %118 = arith.addf %115, %117 : vector<9x32xf32>
    %cst_84 = arith.constant 0.000000e+00 : f32
    %119 = vector.broadcast %cst_84 : f32 to vector<9x32xf32>
    %120 = arith.maximumf %118, %119 : vector<9x32xf32>
    %121 = vector.extract_strided_slice %120 {offsets = [0, 0], sizes = [7, 32], strides = [1, 1]} : vector<9x32xf32> to vector<7x32xf32>
    %c10 = arith.constant 10 : index
    %c0_85 = arith.constant 0 : index
    %c0_86 = arith.constant 0 : index
    %122 = vector.load %arg3[%c10, %c0_85, %c0_86] : memref<19x32x64xf32, #tpu.memory_space<vmem>>, vector<1x32x64xf32>
    %123 = vector.shape_cast %122 : vector<1x32x64xf32> to vector<32x64xf32>
    %124 = vector.extract_strided_slice %123 {offsets = [0, 0], sizes = [32, 32], strides = [1, 1]} : vector<32x64xf32> to vector<32x32xf32>
    %cst_87 = arith.constant dense<0.000000e+00> : vector<7x32xf32>
    %125 = tpu.matmul %121, %124, %cst_87 {dimension_numbers = #tpu.dot_dimension_numbers<[1], [0], [0], [1], [0, 0, 1, 1], [], []>} : vector<7x32xf32>, vector<32x32xf32>, vector<7x32xf32> -> vector<7x32xf32>
    %126 = vector.extract_strided_slice %120 {offsets = [1, 0], sizes = [7, 32], strides = [1, 1]} : vector<9x32xf32> to vector<7x32xf32>
    %c11 = arith.constant 11 : index
    %c0_88 = arith.constant 0 : index
    %c0_89 = arith.constant 0 : index
    %127 = vector.load %arg3[%c11, %c0_88, %c0_89] : memref<19x32x64xf32, #tpu.memory_space<vmem>>, vector<1x32x64xf32>
    %128 = vector.shape_cast %127 : vector<1x32x64xf32> to vector<32x64xf32>
    %129 = vector.extract_strided_slice %128 {offsets = [0, 0], sizes = [32, 32], strides = [1, 1]} : vector<32x64xf32> to vector<32x32xf32>
    %cst_90 = arith.constant dense<0.000000e+00> : vector<7x32xf32>
    %130 = tpu.matmul %126, %129, %cst_90 {dimension_numbers = #tpu.dot_dimension_numbers<[1], [0], [0], [1], [0, 0, 1, 1], [], []>} : vector<7x32xf32>, vector<32x32xf32>, vector<7x32xf32> -> vector<7x32xf32>
    %131 = arith.addf %125, %130 : vector<7x32xf32>
    %132 = vector.extract_strided_slice %120 {offsets = [2, 0], sizes = [7, 32], strides = [1, 1]} : vector<9x32xf32> to vector<7x32xf32>
    %c12 = arith.constant 12 : index
    %c0_91 = arith.constant 0 : index
    %c0_92 = arith.constant 0 : index
    %133 = vector.load %arg3[%c12, %c0_91, %c0_92] : memref<19x32x64xf32, #tpu.memory_space<vmem>>, vector<1x32x64xf32>
    %134 = vector.shape_cast %133 : vector<1x32x64xf32> to vector<32x64xf32>
    %135 = vector.extract_strided_slice %134 {offsets = [0, 0], sizes = [32, 32], strides = [1, 1]} : vector<32x64xf32> to vector<32x32xf32>
    %cst_93 = arith.constant dense<0.000000e+00> : vector<7x32xf32>
    %136 = tpu.matmul %132, %135, %cst_93 {dimension_numbers = #tpu.dot_dimension_numbers<[1], [0], [0], [1], [0, 0, 1, 1], [], []>} : vector<7x32xf32>, vector<32x32xf32>, vector<7x32xf32> -> vector<7x32xf32>
    %137 = arith.addf %131, %136 : vector<7x32xf32>
    %c3_94 = arith.constant 3 : index
    %c0_95 = arith.constant 0 : index
    %138 = vector.load %arg5[%c3_94, %c0_95] : memref<9x64xf32, #tpu.memory_space<vmem>>, vector<1x32xf32>
    %139 = vector.broadcast %138 : vector<1x32xf32> to vector<7x32xf32>
    %140 = arith.addf %137, %139 : vector<7x32xf32>
    %cst_96 = arith.constant 0.000000e+00 : f32
    %141 = vector.broadcast %cst_96 : f32 to vector<7x32xf32>
    %142 = arith.maximumf %140, %141 : vector<7x32xf32>
    %143 = vector.extract_strided_slice %142 {offsets = [0, 0], sizes = [5, 32], strides = [1, 1]} : vector<7x32xf32> to vector<5x32xf32>
    %c13 = arith.constant 13 : index
    %c0_97 = arith.constant 0 : index
    %c0_98 = arith.constant 0 : index
    %144 = vector.load %arg3[%c13, %c0_97, %c0_98] : memref<19x32x64xf32, #tpu.memory_space<vmem>>, vector<1x32x64xf32>
    %145 = vector.shape_cast %144 : vector<1x32x64xf32> to vector<32x64xf32>
    %146 = vector.extract_strided_slice %145 {offsets = [0, 0], sizes = [32, 32], strides = [1, 1]} : vector<32x64xf32> to vector<32x32xf32>
    %cst_99 = arith.constant dense<0.000000e+00> : vector<5x32xf32>
    %147 = tpu.matmul %143, %146, %cst_99 {dimension_numbers = #tpu.dot_dimension_numbers<[1], [0], [0], [1], [0, 0, 1, 1], [], []>} : vector<5x32xf32>, vector<32x32xf32>, vector<5x32xf32> -> vector<5x32xf32>
    %148 = vector.extract_strided_slice %142 {offsets = [1, 0], sizes = [5, 32], strides = [1, 1]} : vector<7x32xf32> to vector<5x32xf32>
    %c14 = arith.constant 14 : index
    %c0_100 = arith.constant 0 : index
    %c0_101 = arith.constant 0 : index
    %149 = vector.load %arg3[%c14, %c0_100, %c0_101] : memref<19x32x64xf32, #tpu.memory_space<vmem>>, vector<1x32x64xf32>
    %150 = vector.shape_cast %149 : vector<1x32x64xf32> to vector<32x64xf32>
    %151 = vector.extract_strided_slice %150 {offsets = [0, 0], sizes = [32, 32], strides = [1, 1]} : vector<32x64xf32> to vector<32x32xf32>
    %cst_102 = arith.constant dense<0.000000e+00> : vector<5x32xf32>
    %152 = tpu.matmul %148, %151, %cst_102 {dimension_numbers = #tpu.dot_dimension_numbers<[1], [0], [0], [1], [0, 0, 1, 1], [], []>} : vector<5x32xf32>, vector<32x32xf32>, vector<5x32xf32> -> vector<5x32xf32>
    %153 = arith.addf %147, %152 : vector<5x32xf32>
    %154 = vector.extract_strided_slice %142 {offsets = [2, 0], sizes = [5, 32], strides = [1, 1]} : vector<7x32xf32> to vector<5x32xf32>
    %c15 = arith.constant 15 : index
    %c0_103 = arith.constant 0 : index
    %c0_104 = arith.constant 0 : index
    %155 = vector.load %arg3[%c15, %c0_103, %c0_104] : memref<19x32x64xf32, #tpu.memory_space<vmem>>, vector<1x32x64xf32>
    %156 = vector.shape_cast %155 : vector<1x32x64xf32> to vector<32x64xf32>
    %157 = vector.extract_strided_slice %156 {offsets = [0, 0], sizes = [32, 32], strides = [1, 1]} : vector<32x64xf32> to vector<32x32xf32>
    %cst_105 = arith.constant dense<0.000000e+00> : vector<5x32xf32>
    %158 = tpu.matmul %154, %157, %cst_105 {dimension_numbers = #tpu.dot_dimension_numbers<[1], [0], [0], [1], [0, 0, 1, 1], [], []>} : vector<5x32xf32>, vector<32x32xf32>, vector<5x32xf32> -> vector<5x32xf32>
    %159 = arith.addf %153, %158 : vector<5x32xf32>
    %c4_106 = arith.constant 4 : index
    %c0_107 = arith.constant 0 : index
    %160 = vector.load %arg5[%c4_106, %c0_107] : memref<9x64xf32, #tpu.memory_space<vmem>>, vector<1x32xf32>
    %161 = vector.broadcast %160 : vector<1x32xf32> to vector<5x32xf32>
    %162 = arith.addf %159, %161 : vector<5x32xf32>
    %cst_108 = arith.constant 0.000000e+00 : f32
    %163 = vector.broadcast %cst_108 : f32 to vector<5x32xf32>
    %164 = arith.maximumf %162, %163 : vector<5x32xf32>
    %165 = vector.extract_strided_slice %164 {offsets = [0, 0], sizes = [3, 32], strides = [1, 1]} : vector<5x32xf32> to vector<3x32xf32>
    %c16 = arith.constant 16 : index
    %c0_109 = arith.constant 0 : index
    %c0_110 = arith.constant 0 : index
    %166 = vector.load %arg3[%c16, %c0_109, %c0_110] : memref<19x32x64xf32, #tpu.memory_space<vmem>>, vector<1x32x64xf32>
    %167 = vector.shape_cast %166 : vector<1x32x64xf32> to vector<32x64xf32>
    %cst_111 = arith.constant dense<0.000000e+00> : vector<3x64xf32>
    %168 = tpu.matmul %165, %167, %cst_111 {dimension_numbers = #tpu.dot_dimension_numbers<[1], [0], [0], [1], [0, 0, 1, 1], [], []>} : vector<3x32xf32>, vector<32x64xf32>, vector<3x64xf32> -> vector<3x64xf32>
    %169 = vector.extract_strided_slice %164 {offsets = [1, 0], sizes = [3, 32], strides = [1, 1]} : vector<5x32xf32> to vector<3x32xf32>
    %c17 = arith.constant 17 : index
    %c0_112 = arith.constant 0 : index
    %c0_113 = arith.constant 0 : index
    %170 = vector.load %arg3[%c17, %c0_112, %c0_113] : memref<19x32x64xf32, #tpu.memory_space<vmem>>, vector<1x32x64xf32>
    %171 = vector.shape_cast %170 : vector<1x32x64xf32> to vector<32x64xf32>
    %cst_114 = arith.constant dense<0.000000e+00> : vector<3x64xf32>
    %172 = tpu.matmul %169, %171, %cst_114 {dimension_numbers = #tpu.dot_dimension_numbers<[1], [0], [0], [1], [0, 0, 1, 1], [], []>} : vector<3x32xf32>, vector<32x64xf32>, vector<3x64xf32> -> vector<3x64xf32>
    %173 = arith.addf %168, %172 : vector<3x64xf32>
    %174 = vector.extract_strided_slice %164 {offsets = [2, 0], sizes = [3, 32], strides = [1, 1]} : vector<5x32xf32> to vector<3x32xf32>
    %c18 = arith.constant 18 : index
    %c0_115 = arith.constant 0 : index
    %c0_116 = arith.constant 0 : index
    %175 = vector.load %arg3[%c18, %c0_115, %c0_116] : memref<19x32x64xf32, #tpu.memory_space<vmem>>, vector<1x32x64xf32>
    %176 = vector.shape_cast %175 : vector<1x32x64xf32> to vector<32x64xf32>
    %cst_117 = arith.constant dense<0.000000e+00> : vector<3x64xf32>
    %177 = tpu.matmul %174, %176, %cst_117 {dimension_numbers = #tpu.dot_dimension_numbers<[1], [0], [0], [1], [0, 0, 1, 1], [], []>} : vector<3x32xf32>, vector<32x64xf32>, vector<3x64xf32> -> vector<3x64xf32>
    %178 = arith.addf %173, %177 : vector<3x64xf32>
    %c5_118 = arith.constant 5 : index
    %c0_119 = arith.constant 0 : index
    %179 = vector.load %arg5[%c5_118, %c0_119] : memref<9x64xf32, #tpu.memory_space<vmem>>, vector<1x64xf32>
    %180 = vector.broadcast %179 : vector<1x64xf32> to vector<3x64xf32>
    %181 = arith.addf %178, %180 : vector<3x64xf32>
    %cst_120 = arith.constant 0.000000e+00 : f32
    %182 = vector.broadcast %cst_120 : f32 to vector<3x64xf32>
    %183 = arith.maximumf %181, %182 : vector<3x64xf32>
    %cst_121 = arith.constant dense<0xFF800000> : vector<64xf32>
    %184 = vector.multi_reduction <maximumf>, %183, %cst_121 [0] : vector<3x64xf32> to vector<64xf32>
    %185 = vector.shape_cast %184 : vector<64xf32> to vector<1x64xf32>
    %c0_122 = arith.constant 0 : index
    %c0_123 = arith.constant 0 : index
    %186 = vector.load %arg4[%c0_122, %c0_123] : memref<128x32xf32, #tpu.memory_space<vmem>>, vector<64x32xf32>
    %cst_124 = arith.constant dense<0.000000e+00> : vector<1x32xf32>
    %187 = tpu.matmul %185, %186, %cst_124 {dimension_numbers = #tpu.dot_dimension_numbers<[1], [0], [0], [1], [0, 0, 1, 1], [], []>} : vector<1x64xf32>, vector<64x32xf32>, vector<1x32xf32> -> vector<1x32xf32>
    %c6_125 = arith.constant 6 : index
    %c0_126 = arith.constant 0 : index
    %188 = vector.load %arg5[%c6_125, %c0_126] : memref<9x64xf32, #tpu.memory_space<vmem>>, vector<1x32xf32>
    %189 = arith.addf %187, %188 : vector<1x32xf32>
    %cst_127 = arith.constant 0.000000e+00 : f32
    %190 = vector.broadcast %cst_127 : f32 to vector<1x32xf32>
    %191 = arith.maximumf %189, %190 : vector<1x32xf32>
    %c64 = arith.constant 64 : index
    %c0_128 = arith.constant 0 : index
    %192 = vector.load %arg4[%c64, %c0_128] : memref<128x32xf32, #tpu.memory_space<vmem>>, vector<32x32xf32>
    %cst_129 = arith.constant dense<0.000000e+00> : vector<1x32xf32>
    %193 = tpu.matmul %191, %192, %cst_129 {dimension_numbers = #tpu.dot_dimension_numbers<[1], [0], [0], [1], [0, 0, 1, 1], [], []>} : vector<1x32xf32>, vector<32x32xf32>, vector<1x32xf32> -> vector<1x32xf32>
    %c7_130 = arith.constant 7 : index
    %c0_131 = arith.constant 0 : index
    %194 = vector.load %arg5[%c7_130, %c0_131] : memref<9x64xf32, #tpu.memory_space<vmem>>, vector<1x32xf32>
    %195 = arith.addf %193, %194 : vector<1x32xf32>
    %cst_132 = arith.constant 0.000000e+00 : f32
    %196 = vector.broadcast %cst_132 : f32 to vector<1x32xf32>
    %197 = arith.maximumf %195, %196 : vector<1x32xf32>
    %c96 = arith.constant 96 : index
    %c0_133 = arith.constant 0 : index
    %198 = vector.load %arg4[%c96, %c0_133] : memref<128x32xf32, #tpu.memory_space<vmem>>, vector<32x4xf32>
    %cst_134 = arith.constant dense<0.000000e+00> : vector<1x4xf32>
    %199 = tpu.matmul %197, %198, %cst_134 {dimension_numbers = #tpu.dot_dimension_numbers<[1], [0], [0], [1], [0, 0, 1, 1], [], []>} : vector<1x32xf32>, vector<32x4xf32>, vector<1x4xf32> -> vector<1x4xf32>
    %c8_135 = arith.constant 8 : index
    %c0_136 = arith.constant 0 : index
    %200 = vector.load %arg5[%c8_135, %c0_136] : memref<9x64xf32, #tpu.memory_space<vmem>>, vector<1x4xf32>
    %201 = arith.addf %199, %200 : vector<1x4xf32>
    %c0_137 = arith.constant 0 : index
    %c0_138 = arith.constant 0 : index
    %c0_139 = arith.constant 0 : index
    %202 = vector.load %arg6[%c0_137, %c0_138, %c0_139] : memref<1x1x4xf32, #tpu.memory_space<vmem>>, vector<1x1x4xf32>
    %203 = vector.shape_cast %202 : vector<1x1x4xf32> to vector<1x4xf32>
    %204 = vector.shape_cast %201 : vector<1x4xf32> to vector<1x1x4xf32>
    tpu.vector_store %arg6[%c0_137, %c0_138, %c0_139], %204 {strides = array<i32>} : memref<1x1x4xf32, #tpu.memory_space<vmem>>, vector<1x1x4xf32>,
    return
  }
  func.func @transform_0(%arg0: i32) -> (i32, i32, i32) {
    %c0_i32 = arith.constant 0 : i32
    %c0_i32_0 = arith.constant 0 : i32
    %c0_i32_1 = arith.constant 0 : i32
    return %arg0, %c0_i32, %c0_i32_0 : i32, i32, i32
  }
  func.func @transform_1(%arg0: i32) -> (i32, i32, i32) {
    %c0_i32 = arith.constant 0 : i32
    %c0_i32_0 = arith.constant 0 : i32
    %c0_i32_1 = arith.constant 0 : i32
    %c0_i32_2 = arith.constant 0 : i32
    return %c0_i32, %c0_i32_0, %c0_i32_1 : i32, i32, i32
  }
  func.func @transform_2(%arg0: i32) -> (i32, i32, i32) {
    %c0_i32 = arith.constant 0 : i32
    %c0_i32_0 = arith.constant 0 : i32
    %c0_i32_1 = arith.constant 0 : i32
    %c0_i32_2 = arith.constant 0 : i32
    return %c0_i32, %c0_i32_0, %c0_i32_1 : i32, i32, i32
  }
  func.func @transform_3(%arg0: i32) -> (i32, i32) {
    %c0_i32 = arith.constant 0 : i32
    %c0_i32_0 = arith.constant 0 : i32
    %c0_i32_1 = arith.constant 0 : i32
    return %c0_i32, %c0_i32_0 : i32, i32
  }
  func.func @transform_4(%arg0: i32) -> (i32, i32) {
    %c0_i32 = arith.constant 0 : i32
    %c0_i32_0 = arith.constant 0 : i32
    %c0_i32_1 = arith.constant 0 : i32
    return %c0_i32, %c0_i32_0 : i32, i32
  }
  func.func @transform_5(%arg0: i32) -> (i32, i32, i32) {
    %c0_i32 = arith.constant 0 : i32
    %c0_i32_0 = arith.constant 0 : i32
    %c0_i32_1 = arith.constant 0 : i32
    return %arg0, %c0_i32, %c0_i32_0 : i32, i32, i32
  }
}

</mosaic_0001>

<bundles_post_ra>
// kernel: tpu_custom_call.1
= control target key start
LH: loop header
LB: loop body
LE: loop exit
PB: predicated region body
PF: predicated region fallthrough
CT: control target
= control target key end

     0   :  { %10 = vsyncpa [#allocation4], 0  ;;  %s7081_s0 = inlined_call_operand.vmem [shape: f32[2,128,68], index: 0, kind: input, shape index: {}]   ;;  %s7082_s1 = inlined_call_operand.vmem [shape: f32[7,68,32], index: 1, kind: input, shape index: {}]   ;;  %s7083_s2 = inlined_call_operand.vmem [shape: f32[19,32,64], index: 2, kind: input, shape index: {}]   ;;  %s7084_s3 = inlined_call_operand.vmem [shape: f32[128,32], index: 3, kind: input, shape index: {}]   ;;  %s7085_s4 = inlined_call_operand.vmem [shape: f32[9,64], index: 4, kind: input, shape index: {}]   ;;  %s7086_s5 = inlined_call_operand.hbm [shape: f32[2,1,4], index: 5, kind: output, shape index: {}]  }
   0x1   :  { %12 = vsyncpa [#allocation4 + $0x1], 0  ;;  %s5544_s18 = smov 0   ;;  %s5546_s19 = smov 0  }
   0x2   :  { %s5548_s20 = smov 0   ;;  %s5550_s21 = smov 0  }
   0x3 LB: > { %s5565_s22 = sadd.s32 4294967295, %s5508_s21   ;;  %s3882_s23 = sadd.s32 4294967294, %s5508_s21   ;;  %s5508_s21 = sphi %s5550_s21, %s7092_s21   ;;  %s5504_s20 = sphi %s5548_s20, %s7091_s20   ;;  %s5500_s19 = sphi %s5546_s19, %s7090_s19   ;;  %s5496_s18 = sphi %s5544_s18, %s7089_s18  }
   0x4   : > { %s5569_s24 = sadd.s32 1, %s5508_s21   ;;  %s135_s25 = sadd.s32 1, %s5504_s20 }
   0x5   : > { %s132_s26 = ssub.s32 %s5508_s21, %s5569_s24  ;;  %p145_p0 = scmp.ne.s32.totalorder %s5504_s20, %s5500_s19 }
   0x6   : > { %p133_p1 = scmp.eq.s32.totalorder %s132_s26, 0  ;;  %p146_p2 = scmp.eq.s32.totalorder %s5565_s22, 1 }
   0x7   : > { %p151_p3 = scmp.ne.s32.totalorder %s5500_s19, %s5496_s18  ;;  %p152_p4 = scmp.eq.s32.totalorder %s3882_s23, 1 }
   0x8   : > { %s5580_s27 = scalar_select %p133_p1, %s5504_s20, %s135_s25  }
   0x9   : > { %p5582_p5 = por %p146_p2, %p145_p0  ;;  %p5586_p6 = por %p152_p4, %p151_p3 }
   0xa   : > { %p3885_p7 = scmp.ge.s32.totalorder %s5508_s21, 1  ;;  %p190_p8 = scmp.lt.s32.totalorder %s5508_s21, 3 }
   0xc   : > { %p191_p9 = pnand %p3885_p7, %p190_p8 }
   0xd   : > { %v3888_v0 = vld [vmem:[%s7082_s1 + $0x48] sm:$0xff] (!%p191_p9)  ;;  %v3889_v1 = vld [vmem:[%s7082_s1 + $0x50] sm:$0xff] (!%p191_p9)  ;;  %v238_v2 = vld [vmem:[%s7082_s1] sm:$0xff] (!%p191_p9)  ;;  %p217_p10 = scmp.lt.s32.totalorder (!%p191_p9), %s5565_s22, 1  ;;  %vm257_vm0 = vcmask (!%p191_p9), 556032   ;;  %vm306_vm1 = vcmask (!%p191_p9), 1043456  }
   0xe   : > { %194 = sbr.rel (%p191_p9) target bundleno = 2284 (0x8ec), region = 40  ;;  %v5144_v3 = vpack.c.bf16 (!%p191_p9), %v3889_v1, %v3888_v0  ;;  %v239_v4 = vld [vmem:[%s7082_s1 + $0x8] sm:$0xff] (!%p191_p9)  ;;  %v3890_v5 = vld [vmem:[%s7082_s1 + $0x58] sm:$0xff] (!%p191_p9)  ;;  %v3891_v6 = vld [vmem:[%s7082_s1 + $0x60] sm:$0xff] (!%p191_p9)  ;;  %vm5511_vm2 = vmmov (!%p191_p9), 0   ;;  %vm1710_vm9 = vcmask (!%p191_p9), 261120  }
   0xf   : > { %v5160_v7 = vpack.c.bf16 (!%p191_p9), %v239_v4, %v238_v2  ;;  %v5148_v8 = vpack.c.bf16 (!%p191_p9), %v3891_v6, %v3890_v5  ;;  %v240_v9 = vld [vmem:[%s7082_s1 + $0x10] sm:$0xff] (!%p191_p9)  ;;  %v241_v10 = vld [vmem:[%s7082_s1 + $0x18] sm:$0xff] (!%p191_p9)  ;;  %v3892_v11 = vld [vmem:[%s7082_s1 + $0x68] sm:$0xff] (!%p191_p9)  ;;  %vm1726_vm10 = vcmask (!%p191_p9), 254976   ;;  %vm2573_vm11 = vcmask (!%p191_p9), 1046528   ;;  %s215_s25 = sand.u32 (!%p191_p9), 1, %s5500_s19  }
  0x10   : > { %5145 = vmatprep.subr.bf16.mxu0 (!%p191_p9), %v5144_v3  ;;  %v5164_v12 = vpack.c.bf16 (!%p191_p9), %v241_v10, %v240_v9  ;;  %v3893_v13 = vld [vmem:[%s7082_s1 + $0x70] sm:$0xff] (!%p191_p9)  ;;  %v242_v14 = vld [vmem:[%s7082_s1 + $0x20] sm:$0xff] (!%p191_p9)  ;;  %v243_v15 = vld [vmem:[%s7082_s1 + $0x28] sm:$0xff] (!%p191_p9)  ;;  %vm2740_vm12 = vcmask (!%p191_p9), 1045504   ;;  %vm3563_vm13 = vcmask (!%p191_p9), 518144   ;;  %vm3580_vm14 = vcmask (!%p191_p9), 523264  }
  0x11   : > { %5147 = vmatpush3.bf16.msra.mxu0 (!%p191_p9), %v5144_v3  ;;  %5161 = vmatprep.subr.bf16.mxu1 (!%p191_p9), %v5160_v7  ;;  %v5152_v16 = vpack.c.bf16 (!%p191_p9), %v3893_v13, %v3892_v11  ;;  %v5168_v17 = vpack.c.bf16 (!%p191_p9), %v243_v15, %v242_v14  ;;  %v3894_v18 = vld [vmem:[%s7082_s1 + $0x78] sm:$0xff] (!%p191_p9)  ;;  %v3895_v19 = vld [vmem:[%s7082_s1 + $0x80] sm:$0xff] (!%p191_p9)  ;;  %v244_v21 = vld [vmem:[%s7082_s1 + $0x30] sm:$0xff] (!%p191_p9)  ;;  %s4192_s6 = sshll.u32 (!%p191_p9), %s5565_s22, 4  ;;  %vm3812_vm15 = vcmask (!%p191_p9), 24576   ;;  %s3815_s12 = scalar_lea.sflag (!%p191_p9), [#allocation4], %s215_s25 }
  0x12   : > { %5163 = vmatpush3.bf16.msra.mxu1 (!%p191_p9), %v5160_v7  ;;  %5149 = vmatprep.subr.bf16.mxu0 (!%p191_p9), %v5148_v8  ;;  %v245_v22 = vld [vmem:[%s7082_s1 + $0x38] sm:$0xff] (!%p191_p9)  ;;  %v5156_v23 = vpack.c.bf16 (!%p191_p9), %v3895_v19, %v3894_v18  ;;  %v3896_v25 = vld [vmem:[%s7082_s1 + $0x88] sm:$0xf] (!%p191_p9)  ;;  %v3931_v26 = vld [vmem:[%s7082_s1 + $0x90] sm:$0xff] (!%p191_p9)  ;;  %s7039_s11 = scalar_lea.hbm (!%p191_p9), %s7086_s5, %s4192_s6 }
  0x13   : > { %5165 = vmatprep.subr.bf16.mxu1 (!%p191_p9), %v5164_v12  ;;  %v5172_v24 = vpack.c.bf16 (!%p191_p9), %v245_v22, %v244_v21  ;;  %v3932_v27 = vld [vmem:[%s7082_s1 + $0x98] sm:$0xff] (!%p191_p9)  ;;  %v246_v28 = vld [vmem:[%s7082_s1 + $0x40] sm:$0xf] (!%p191_p9)  ;;  %v3934_v31 = vld [vmem:[%s7082_s1 + $0xa8] sm:$0xff] (!%p191_p9) }
  0x14   : > { %v5176_v29 = vpack.c.bf16 (!%p191_p9), %v3932_v27, %v3931_v26  ;;  %v3933_v30 = vld [vmem:[%s7082_s1 + $0xa0] sm:$0xff] (!%p191_p9)  ;;  %v3957_v33 = vld [vmem:[%s7082_s1 + $0xd8] sm:$0xff] (!%p191_p9)  ;;  %v3935_v37 = vld [vmem:[%s7082_s1 + $0xb0] sm:$0xff] (!%p191_p9) }
  0x15   : > { %s218_s7 = scalar_select %p217_p10, %s5565_s22, 1  ;;  %5151 = vmatpush3.bf16.msra.mxu0 %v5148_v8  ;;  %v3958_v34 = vld [vmem:[%s7082_s1 + $0xe0] sm:$0xff]  ;;  %v5180_v36 = vpack.c.bf16 %v3934_v31, %v3933_v30  ;;  %v3936_v38 = vld [vmem:[%s7082_s1 + $0xb8] sm:$0xff]  ;;  %v3959_v41 = vld [vmem:[%s7082_s1 + $0xe8] sm:$0xff] }
  0x16   : > { %5167 = vmatpush3.bf16.msra.mxu1 %v5164_v12  ;;  %5153 = vmatprep.subr.bf16.mxu0 %v5152_v16  ;;  %v5192_v39 = vpack.c.bf16 %v3958_v34, %v3957_v33  ;;  %v3960_v42 = vld [vmem:[%s7082_s1 + $0xf0] sm:$0xff]  ;;  %v5184_v44 = vpack.c.bf16 %v3936_v38, %v3935_v37  ;;  %v3937_v45 = vld [vmem:[%s7082_s1 + $0xc0] sm:$0xff]  ;;  %v3938_v46 = vld [vmem:[%s7082_s1 + $0xc8] sm:$0xff]  ;;  %s5513_s22 = smov [#allocation3]  }
  0x17   : > { %s4195_s14 = sshll.u32 %s218_s7, 7  ;;  %5169 = vmatprep.subr.bf16.mxu1 %v5168_v17  ;;  %v5196_v47 = vpack.c.bf16 %v3960_v42, %v3959_v41  ;;  %v3961_v49 = vld [vmem:[%s7082_s1 + $0xf8] sm:$0xff]  ;;  %v3962_v50 = vld [vmem:[%s7082_s1 + $0x100] sm:$0xff]  ;;  %v5188_v52 = vpack.c.bf16 %v3938_v46, %v3937_v45  ;;  %v3963_v55 = vld [vmem:[%s7082_s1 + $0x108] sm:$0xff]  ;;  %s216_s7 = scalar_lea.vmem [#allocation3], %s215_s25 }
  0x18   : > { %s5633_s17 = scalar_lea.vmem %s7081_s0, %s4195_s14  ;;  %v5200_v53 = vpack.c.bf16 %v3962_v50, %v3961_v49  ;;  %v3964_v56 = vld [vmem:[%s7082_s1 + $0x110] sm:$0xff]  ;;  %v3983_v59 = vld [vmem:[%s7082_s1 + $0x120] sm:$0xff]  ;;  %v3984_v60 = vld [vmem:[%s7082_s1 + $0x128] sm:$0xff]  ;;  %s3827_s8 = sshll.u32 %s216_s7, 4  ;;  %s7041_s8 = int_to_ptr.vmem [resolvable:$true] %s3827_s8 }
  0x19   : > { %v5642_v20 = vld [vmem:[%s5633_s17] sm:$0xff]  ;;  %5155 = vmatpush3.bf16.msra.mxu0 %v5152_v16  ;;  %v5674_v32 = vld [vmem:[%s5633_s17 + $0x8] sm:$0xff]  ;;  %v5685_v35 = vld [vmem:[%s5633_s17 + $0x10] sm:$0xff]  ;;  %v5204_v61 = vpack.c.bf16 %v3964_v56, %v3963_v55  ;;  %v5208_v0 = vpack.c.bf16 %v3984_v60, %v3983_v59  ;;  %v471_v56 = vlaneseq  ;;  %s5446_s13 = scalar_lea.vmem %s7041_s8, 16  ;;  %s5450_s14 = sshll.u32 %s5513_s22, 4  ;;  %s5451_s14 = int_to_ptr.vmem [resolvable:$false] %s5450_s14 }
  0x1a   : > { %4534 = vmatprep.mubr.msk.f32.mxu0 %vm257_vm0, %v5642_v20  ;;  %4576 = vmatprep.mubr.msk.f32.mxu1 %vm257_vm0, %v5642_v20  ;;  %v5697_v40 = vld [vmem:[%s5633_s17 + $0x18] sm:$0xff]  ;;  %v5710_v43 = vld [vmem:[%s5633_s17 + $0x20] sm:$0xff]  ;;  %v5725_v48 = vld [vmem:[%s5633_s17 + $0x28] sm:$0xff]  ;;  %p5447_p11 = scmp.ne.s32.totalorder %s7041_s8, %s5446_s13  ;;  %s5452_s15 = scalar_lea.vmem %s5451_s14, 32 }
  0x1b   : > { %5171 = vmatpush3.bf16.msra.mxu1 %v5168_v17  ;;  %5157 = vmatprep.subr.bf16.mxu0 %v5156_v23  ;;  %v5736_v51 = vld [vmem:[%s5633_s17 + $0x30] sm:$0xff]  ;;  %v5745_v54 = vld [vmem:[%s5633_s17 + $0x38] sm:$0xff]  ;;  %v5756_v57 = vld [vmem:[%s5633_s17 + $0x40] sm:$0xff]  ;;  %p5453_p0 = scmp.lt.s32.totalorder %s7041_s8, %s5451_s14  ;;  %p5454_p1 = scmp.lt.s32.totalorder %s5452_s15, %s5446_s13 }
  0x1c   : > { %5173 = vmatprep.subr.bf16.mxu1 %v5172_v24  ;;  %v3939_v58 = vld [vmem:[%s7082_s1 + $0xd0] sm:$0xf]  ;;  %v5774_v62 = vld [vmem:[%s5633_s17 + $0x48] sm:$0xff]  ;;  %v5787_v1 = vld [vmem:[%s5633_s17 + $0x58] sm:$0xff]  ;;  %p5448_p12 = pnand %p5447_p11, %p5582_p5 }
  0x1d   : > { %5159 = vmatpush3.bf16.msra.mxu0 %v5156_v23  ;;  %v5779_v63 = vld [vmem:[%s5633_s17 + $0x50] sm:$0xff]  ;;  %v3965_v2 = vld [vmem:[%s7082_s1 + $0x118] sm:$0xf]  ;;  %v4009_v3 = vld [vmem:[%s7082_s1 + $0x168] sm:$0xff]  ;;  %p5455_p2 = por %p5454_p1, %p5453_p0 }
  0x1e   : > { %4532 = vmatprep.subr.msk.mxu0 %vm306_vm1, %v3896_v25  ;;  %v4010_v4 = vld [vmem:[%s7082_s1 + $0x170] sm:$0xff]  ;;  %v5804_v5 = vld [vmem:[%s5633_s17 + $0x60] sm:$0xff]  ;;  %v5814_v7 = vld [vmem:[%s5633_s17 + $0x68] sm:$0xff]  ;;  %p5449_p13 = pneg %p5448_p12 }
  0x1f   : > { %5175 = vmatpush3.bf16.msra.mxu1 %v5172_v24  ;;  %v5224_v6 = vpack.c.bf16 %v4010_v4, %v4009_v3  ;;  %v5819_v8 = vld [vmem:[%s5633_s17 + $0x70] sm:$0xff]  ;;  %v5829_v9 = vld [vmem:[%s5633_s17 + $0x78] sm:$0xff]  ;;  %v4012_v13 = vld [vmem:[%s7082_s1 + $0x180] sm:$0xff] }
  0x20   : > { %4574 = vmatprep.subr.msk.mxu1 %vm306_vm1, %v246_v28  ;;  %v3985_v10 = vld [vmem:[%s7082_s1 + $0x130] sm:$0xff]  ;;  %v3986_v11 = vld [vmem:[%s7082_s1 + $0x138] sm:$0xff]  ;;  %v3987_v15 = vld [vmem:[%s7082_s1 + $0x140] sm:$0xff]  ;;  %p5456_p3 = pnand %p5455_p2, %p5449_p13 }
  0x21   : > { %4533 = vmatpush3.msk.msra.mxu0 %vm306_vm1, %v3896_v25  ;;  %v4011_v12 = vld [vmem:[%s7082_s1 + $0x178] sm:$0xff]  ;;  %v5212_v14 = vpack.c.bf16 %v3986_v11, %v3985_v10  ;;  %v3988_v16 = vld [vmem:[%s7082_s1 + $0x148] sm:$0xff]  ;;  %v4014_v19 = vld [vmem:[%s7082_s1 + $0x190] sm:$0xff] }
  0x22   : > { %4535 = vmatmul.mubr.msk.f32.vlgmr.msra.gmra.mrb[0].mxu0 %vm257_vm0, %v5674_v32  ;;  %5177 = vmatprep.subr.bf16.mxu0 %v5176_v29  ;;  %v5228_v17 = vpack.c.bf16 %v4012_v13, %v4011_v12  ;;  %v4013_v18 = vld [vmem:[%s7082_s1 + $0x188] sm:$0xff]  ;;  %v5216_v21 = vpack.c.bf16 %v3988_v16, %v3987_v15  ;;  %v3989_v22 = vld [vmem:[%s7082_s1 + $0x150] sm:$0xff]  ;;  %v3990_v23 = vld [vmem:[%s7082_s1 + $0x158] sm:$0xff] }
  0x23   : > { %4575 = vmatpush3.msk.msra.mxu1 %vm306_vm1, %v246_v28  ;;  %5179 = vmatpush3.bf16.msra.mxu0 %v5176_v29  ;;  %v5232_v24 = vpack.c.bf16 %v4014_v19, %v4013_v18  ;;  %v4015_v25 = vld [vmem:[%s7082_s1 + $0x198] sm:$0xff]  ;;  %v4016_v26 = vld [vmem:[%s7082_s1 + $0x1a0] sm:$0xff]  ;;  %v5220_v27 = vpack.c.bf16 %v3990_v23, %v3989_v22  ;;  %v4035_v30 = vld [vmem:[%s7082_s1 + $0x1b0] sm:$0xff] }
  0x24   : > { %4577 = vmatmul.mubr.msk.f32.vlgmr.msra.gmra.mrb[0].mxu1 %vm257_vm0, %v5674_v32  ;;  %4537 = vmatprep.mubr.msk.f32.mxu0 %vm257_vm0, %v5685_v35  ;;  %v5236_v28 = vpack.c.bf16 %v4016_v26, %v4015_v25  ;;  %v3991_v29 = vld [vmem:[%s7082_s1 + $0x160] sm:$0xf]  ;;  %v4036_v31 = vld [vmem:[%s7082_s1 + $0x1b8] sm:$0xff]  ;;  %v4017_v33 = vld [vmem:[%s7082_s1 + $0x1a8] sm:$0xf] }
  0x25   : > { %4579 = vmatprep.mubr.msk.f32.mxu1 %vm257_vm0, %v5685_v35  ;;  %5181 = vmatprep.subr.bf16.mxu0 %v5180_v36  ;;  %v5240_v34 = vpack.c.bf16 %v4036_v31, %v4035_v30  ;;  %v4038_v37 = vld [vmem:[%s7082_s1 + $0x1c8] sm:$0xff]  ;;  %v4040_v41 = vld [vmem:[%s7082_s1 + $0x1d8] sm:$0xff]  ;;  %v4064_v50 = vld [vmem:[%s7083_s2 + $0x30] sm:$0xff] }
  0x26   : > { %4538 = vmatmul.mubr.msk.f32.gmra.mrb[2].mxu0 %vm257_vm0, %v5697_v40  ;;  %5193 = vmatprep.subr.bf16.mxu1 %v5192_v39  ;;  %v4042_v45 = vld [vmem:[%s7082_s1 + $0x1e8] sm:$0xff] }
  0x27   : > { %4540 = vmatprep.mubr.msk.f32.mxu0 %vm257_vm0, %v5710_v43  ;;  %5183 = vmatpush3.bf16.msra.mxu0 %v5180_v36  ;;  %v4037_v36 = vld [vmem:[%s7082_s1 + $0x1c0] sm:$0xff] }
  0x28   : > { %4580 = vmatmul.mubr.msk.f32.gmra.mrb[2].mxu1 %vm257_vm0, %v5697_v40  ;;  %5185 = vmatprep.subr.bf16.mxu0 %v5184_v44  ;;  %v5244_v38 = vpack.c.bf16 %v4038_v37, %v4037_v36 }
  0x29   : > { %4582 = vmatprep.mubr.msk.f32.mxu1 %vm257_vm0, %v5710_v43  ;;  %5195 = vmatpush3.bf16.msra.mxu1 %v5192_v39  ;;  %v4039_v39 = vld [vmem:[%s7082_s1 + $0x1d0] sm:$0xff] }
  0x2a   : > { %4541 = vmatmul.mubr.msk.f32.gmra.mrb[4].mxu0 %vm257_vm0, %v5725_v48  ;;  %5197 = vmatprep.subr.bf16.mxu1 %v5196_v47  ;;  %v5248_v42 = vpack.c.bf16 %v4040_v41, %v4039_v39 }
  0x2b   : > { %4543 = vmatprep.mubr.msk.f32.mxu0 %vm257_vm0, %v5736_v51  ;;  %5187 = vmatpush3.bf16.msra.mxu0 %v5184_v44  ;;  %v4041_v44 = vld [vmem:[%s7082_s1 + $0x1e0] sm:$0xff] }
  0x2c   : > { %4583 = vmatmul.mubr.msk.f32.gmra.mrb[4].mxu1 %vm257_vm0, %v5725_v48  ;;  %5189 = vmatprep.subr.bf16.mxu0 %v5188_v52  ;;  %v5252_v46 = vpack.c.bf16 %v4042_v45, %v4041_v44 }
  0x2d   : > { %4585 = vmatprep.mubr.msk.f32.mxu1 %vm257_vm0, %v5736_v51  ;;  %5199 = vmatpush3.bf16.msra.mxu1 %v5196_v47  ;;  %v4043_v47 = vld [vmem:[%s7082_s1 + $0x1f0] sm:$0xf] }
  0x2e   : > { %4544 = vmatmul.mubr.msk.f32.gmra.mrb[6].mxu0 %vm257_vm0, %v5745_v54  ;;  %5201 = vmatprep.subr.bf16.mxu1 %v5200_v53 }
  0x2f   : > { %4546 = vmatprep.mubr.msk.f32.mxu0 %vm257_vm0, %v5756_v57  ;;  %5191 = vmatpush3.bf16.msra.mxu0 %v5188_v52  ;;  %v4078_v52 = vld [vmem:[%s7083_s2 + $0x50] sm:$0xff] }
  0x30   : > { %4586 = vmatmul.mubr.msk.f32.gmra.mrb[6].mxu1 %vm257_vm0, %v5745_v54  ;;  %4616 = vmatprep.subr.msk.mxu0 %vm306_vm1, %v3939_v58 }
  0x31   : > { %4588 = vmatprep.mubr.msk.f32.mxu1 %vm257_vm0, %v5756_v57  ;;  %5203 = vmatpush3.bf16.msra.mxu1 %v5200_v53 }
  0x32   : > { %4547 = vmatmul.mubr.msk.f32.gmra.mrb[8].mxu0 %vm257_vm0, %v5774_v62  ;;  %5205 = vmatprep.subr.bf16.mxu1 %v5204_v61 }
  0x33   : > { %4549 = vmatprep.mubr.msk.f32.mxu0 %vm257_vm0, %v5779_v63  ;;  %4617 = vmatpush3.msk.msra.mxu0 %vm306_vm1, %v3939_v58  ;;  %v6108_v58 = vshrl.u32 %v471_v56, 7 }
  0x34   : > { %4589 = vmatmul.mubr.msk.f32.gmra.mrb[8].mxu1 %vm257_vm0, %v5774_v62  ;;  %5209 = vmatprep.subr.bf16.mxu0 %v5208_v0 }
  0x35   : > { %4591 = vmatprep.mubr.msk.f32.mxu1 %vm257_vm0, %v5779_v63  ;;  %5207 = vmatpush3.bf16.msra.mxu1 %v5204_v61  ;;  %vm473_vm3 = vcmp.lt.s32.totalorder %v6108_v58, 7  ;;  %vm812_vm4 = vcmp.lt.s32.totalorder %v6108_v58, 6  ;;  %vm1019_vm5 = vcmp.lt.s32.totalorder %v6108_v58, 5  ;;  %vm1226_vm6 = vcmp.lt.s32.totalorder %v6108_v58, 4 }
  0x36   : > { %4550 = vmatmul.mubr.msk.f32.gmra.mrb[10].mxu0 %vm257_vm0, %v5787_v1  ;;  %4658 = vmatprep.subr.msk.mxu1 %vm306_vm1, %v3965_v2  ;;  %vm1433_vm7 = vcmp.lt.s32.totalorder %v6108_v58, 3  ;;  %vm1640_vm8 = vcmp.lt.s32.totalorder %v6108_v58, 2 }
  0x37   : > { %4552 = vmatprep.mubr.msk.f32.mxu0 %vm257_vm0, %v5804_v5 }
  0x38   : > { %4592 = vmatmul.mubr.msk.f32.gmra.mrb[10].mxu1 %vm257_vm0, %v5787_v1 }
  0x39   : > { %4594 = vmatprep.mubr.msk.f32.mxu1 %vm257_vm0, %v5804_v5  ;;  %4659 = vmatpush3.msk.msra.mxu1 %vm306_vm1, %v3965_v2 }
  0x3a   : > { %4553 = vmatmul.mubr.msk.f32.gmra.mrb[12].mxu0 %vm257_vm0, %v5814_v7  ;;  %5225 = vmatprep.subr.bf16.mxu1 %v5224_v6 }
  0x3b   : > { %4555 = vmatprep.mubr.msk.f32.mxu0 %vm257_vm0, %v5819_v8 }
  0x3c   : > { %4595 = vmatmul.mubr.msk.f32.gmra.mrb[12].mxu1 %vm257_vm0, %v5814_v7 }
  0x3d   : > { %4597 = vmatprep.mubr.msk.f32.mxu1 %vm257_vm0, %v5819_v8 }
  0x3e   : > { %4556 = vmatmul.mubr.msk.f32.gmra.mrb[14].mxu0 %vm257_vm0, %v5829_v9 }
  0x3f   : > { %4618 = vmatprep.mubr.msk.f32.mxu0 %vm257_vm0, %v5642_v20 }
  0x40   : > { %4598 = vmatmul.mubr.msk.f32.gmra.mrb[14].mxu1 %vm257_vm0, %v5829_v9 }
  0x41   : > { %4660 = vmatprep.mubr.msk.f32.mxu1 %vm257_vm0, %v5642_v20 }
  0x42   : > { %4619 = vmatmul.mubr.msk.f32.vlgmr.msra.gmra.mrb[16].mxu0 %vm257_vm0, %v5674_v32 }
  0x43   : > { %5211 = vmatpush3.bf16.msra.mxu0 %v5208_v0  ;;  %4621 = vmatprep.mubr.msk.f32.mxu0 %vm257_vm0, %v5685_v35 }
  0x44   : > { %4661 = vmatmul.mubr.msk.f32.vlgmr.msra.gmra.mrb[16].mxu1 %vm257_vm0, %v5674_v32  ;;  %5213 = vmatprep.subr.bf16.mxu0 %v5212_v14 }
  0x45   : > { %4663 = vmatprep.mubr.msk.f32.mxu1 %vm257_vm0, %v5685_v35  ;;  %5227 = vmatpush3.bf16.msra.mxu1 %v5224_v6 }
  0x46   : > { %4622 = vmatmul.mubr.msk.f32.gmra.mrb[18].mxu0 %vm257_vm0, %v5697_v40  ;;  %5229 = vmatprep.subr.bf16.mxu1 %v5228_v17 }
  0x47   : > { %4624 = vmatprep.mubr.msk.f32.mxu0 %vm257_vm0, %v5710_v43  ;;  %5215 = vmatpush3.bf16.msra.mxu0 %v5212_v14 }
  0x48   : > { %4664 = vmatmul.mubr.msk.f32.gmra.mrb[18].mxu1 %vm257_vm0, %v5697_v40  ;;  %5217 = vmatprep.subr.bf16.mxu0 %v5216_v21 }
  0x49   : > { %4666 = vmatprep.mubr.msk.f32.mxu1 %vm257_vm0, %v5710_v43  ;;  %5231 = vmatpush3.bf16.msra.mxu1 %v5228_v17 }
  0x4a   : > { %4625 = vmatmul.mubr.msk.f32.gmra.mrb[20].mxu0 %vm257_vm0, %v5725_v48  ;;  %5233 = vmatprep.subr.bf16.mxu1 %v5232_v24 }
  0x4b   : > { %4627 = vmatprep.mubr.msk.f32.mxu0 %vm257_vm0, %v5736_v51  ;;  %5219 = vmatpush3.bf16.msra.mxu0 %v5216_v21 }
  0x4c   : > { %4667 = vmatmul.mubr.msk.f32.gmra.mrb[20].mxu1 %vm257_vm0, %v5725_v48  ;;  %5221 = vmatprep.subr.bf16.mxu0 %v5220_v27 }
  0x4d   : > { %4669 = vmatprep.mubr.msk.f32.mxu1 %vm257_vm0, %v5736_v51  ;;  %5235 = vmatpush3.bf16.msra.mxu1 %v5232_v24 }
  0x4e   : > { %4628 = vmatmul.mubr.msk.f32.gmra.mrb[22].mxu0 %vm257_vm0, %v5745_v54  ;;  %5237 = vmatprep.subr.bf16.mxu1 %v5236_v28 }
  0x4f   : > { %4630 = vmatprep.mubr.msk.f32.mxu0 %vm257_vm0, %v5756_v57  ;;  %5223 = vmatpush3.bf16.msra.mxu0 %v5220_v27 }
  0x50   : > { %4670 = vmatmul.mubr.msk.f32.gmra.mrb[22].mxu1 %vm257_vm0, %v5745_v54  ;;  %4700 = vmatprep.subr.msk.mxu0 %vm306_vm1, %v3991_v29 }
  0x51   : > { %4672 = vmatprep.mubr.msk.f32.mxu1 %vm257_vm0, %v5756_v57  ;;  %5239 = vmatpush3.bf16.msra.mxu1 %v5236_v28 }
  0x52   : > { %4631 = vmatmul.mubr.msk.f32.gmra.mrb[24].mxu0 %vm257_vm0, %v5774_v62  ;;  %4742 = vmatprep.subr.msk.mxu1 %vm306_vm1, %v4017_v33 }
  0x53   : > { %4633 = vmatprep.mubr.msk.f32.mxu0 %vm257_vm0, %v5779_v63  ;;  %4701 = vmatpush3.msk.msra.mxu0 %vm306_vm1, %v3991_v29 }
  0x54   : > { %4673 = vmatmul.mubr.msk.f32.gmra.mrb[24].mxu1 %vm257_vm0, %v5774_v62  ;;  %5241 = vmatprep.subr.bf16.mxu0 %v5240_v34 }
  0x55   : > { %4675 = vmatprep.mubr.msk.f32.mxu1 %vm257_vm0, %v5779_v63  ;;  %4743 = vmatpush3.msk.msra.mxu1 %vm306_vm1, %v4017_v33 }
  0x56   : > { %4634 = vmatmul.mubr.msk.f32.gmra.mrb[26].mxu0 %vm257_vm0, %v5787_v1 }
  0x57   : > { %4636 = vmatprep.mubr.msk.f32.mxu0 %vm257_vm0, %v5804_v5 }
  0x58   : > { %4676 = vmatmul.mubr.msk.f32.gmra.mrb[26].mxu1 %vm257_vm0, %v5787_v1 }
  0x59   : > { %4678 = vmatprep.mubr.msk.f32.mxu1 %vm257_vm0, %v5804_v5 }
  0x5a   : > { %4637 = vmatmul.mubr.msk.f32.gmra.mrb[28].mxu0 %vm257_vm0, %v5814_v7 }
  0x5b   : > { %4639 = vmatprep.mubr.msk.f32.mxu0 %vm257_vm0, %v5819_v8 }
  0x5c   : > { %4679 = vmatmul.mubr.msk.f32.gmra.mrb[28].mxu1 %vm257_vm0, %v5814_v7 }
  0x5d   : > { %4681 = vmatprep.mubr.msk.f32.mxu1 %vm257_vm0, %v5819_v8 }
  0x5e   : > { %4640 = vmatmul.mubr.msk.f32.gmra.mrb[30].mxu0 %vm257_vm0, %v5829_v9 }
  0x5f   : > { %4702 = vmatprep.mubr.msk.f32.mxu0 %vm257_vm0, %v5642_v20 }
  0x60   : > { %4682 = vmatmul.mubr.msk.f32.gmra.mrb[30].mxu1 %vm257_vm0, %v5829_v9 }
  0x61   : > { %4744 = vmatprep.mubr.msk.f32.mxu1 %vm257_vm0, %v5642_v20 }
  0x62   : > { %4703 = vmatmul.mubr.msk.f32.vlgmr.msra.gmra.mrb[32].mxu0 %vm257_vm0, %v5674_v32 }
  0x63   : > { %5243 = vmatpush3.bf16.msra.mxu0 %v5240_v34  ;;  %4705 = vmatprep.mubr.msk.f32.mxu0 %vm257_vm0, %v5685_v35 }
  0x64   : > { %4745 = vmatmul.mubr.msk.f32.vlgmr.msra.gmra.mrb[32].mxu1 %vm257_vm0, %v5674_v32  ;;  %5245 = vmatprep.subr.bf16.mxu0 %v5244_v38 }
  0x65   : > { %4747 = vmatprep.mubr.msk.f32.mxu1 %vm257_vm0, %v5685_v35 }
  0x66   : > { %4706 = vmatmul.mubr.msk.f32.gmra.mrb[34].mxu0 %vm257_vm0, %v5697_v40 }
  0x67   : > { %4708 = vmatprep.mubr.msk.f32.mxu0 %vm257_vm0, %v5710_v43  ;;  %5247 = vmatpush3.bf16.msra.mxu0 %v5244_v38 }
  0x68   : > { %4748 = vmatmul.mubr.msk.f32.gmra.mrb[34].mxu1 %vm257_vm0, %v5697_v40  ;;  %5249 = vmatprep.subr.bf16.mxu0 %v5248_v42 }
  0x69   : > { %4750 = vmatprep.mubr.msk.f32.mxu1 %vm257_vm0, %v5710_v43 }
  0x6a   : > { %4709 = vmatmul.mubr.msk.f32.gmra.mrb[36].mxu0 %vm257_vm0, %v5725_v48 }
  0x6b   : > { %4711 = vmatprep.mubr.msk.f32.mxu0 %vm257_vm0, %v5736_v51  ;;  %5251 = vmatpush3.bf16.msra.mxu0 %v5248_v42 }
  0x6c   : > { %4751 = vmatmul.mubr.msk.f32.gmra.mrb[36].mxu1 %vm257_vm0, %v5725_v48  ;;  %5253 = vmatprep.subr.bf16.mxu0 %v5252_v46 }
  0x6d   : > { %4753 = vmatprep.mubr.msk.f32.mxu1 %vm257_vm0, %v5736_v51 }
  0x6e   : > { %4712 = vmatmul.mubr.msk.f32.gmra.mrb[38].mxu0 %vm257_vm0, %v5745_v54 }
  0x6f   : > { %4714 = vmatprep.mubr.msk.f32.mxu0 %vm257_vm0, %v5756_v57  ;;  %5255 = vmatpush3.bf16.msra.mxu0 %v5252_v46 }
  0x70   : > { %4754 = vmatmul.mubr.msk.f32.gmra.mrb[38].mxu1 %vm257_vm0, %v5745_v54  ;;  %4784 = vmatprep.subr.msk.mxu0 %vm306_vm1, %v4043_v47 }
  0x71   : > { %4756 = vmatprep.mubr.msk.f32.mxu1 %vm257_vm0, %v5756_v57 }
  0x72   : > { %4715 = vmatmul.mubr.msk.f32.gmra.mrb[40].mxu0 %vm257_vm0, %v5774_v62 }
  0x73   : > { %4717 = vmatprep.mubr.msk.f32.mxu0 %vm257_vm0, %v5779_v63  ;;  %4785 = vmatpush3.msk.msra.mxu0 %vm306_vm1, %v4043_v47 }
  0x74   : > { %4757 = vmatmul.mubr.msk.f32.gmra.mrb[40].mxu1 %vm257_vm0, %v5774_v62 }
  0x75   : > { %4759 = vmatprep.mubr.msk.f32.mxu1 %vm257_vm0, %v5779_v63 }
  0x76   : > { %4718 = vmatmul.mubr.msk.f32.gmra.mrb[42].mxu0 %vm257_vm0, %v5787_v1 }
  0x77   : > { %4720 = vmatprep.mubr.msk.f32.mxu0 %vm257_vm0, %v5804_v5 }
  0x78   : > { %4760 = vmatmul.mubr.msk.f32.gmra.mrb[42].mxu1 %vm257_vm0, %v5787_v1 }
  0x79   : > { %4762 = vmatprep.mubr.msk.f32.mxu1 %vm257_vm0, %v5804_v5 }
  0x7a   : > { %4721 = vmatmul.mubr.msk.f32.gmra.mrb[44].mxu0 %vm257_vm0, %v5814_v7 }
  0x7b   : > { %4723 = vmatprep.mubr.msk.f32.mxu0 %vm257_vm0, %v5819_v8 }
  0x7c   : > { %4763 = vmatmul.mubr.msk.f32.gmra.mrb[44].mxu1 %vm257_vm0, %v5814_v7 }
  0x7d   : > { %4765 = vmatprep.mubr.msk.f32.mxu1 %vm257_vm0, %v5819_v8 }
  0x7e   : > { %4724 = vmatmul.mubr.msk.f32.gmra.mrb[46].mxu0 %vm257_vm0, %v5829_v9 }
  0x7f   : > { %4786 = vmatprep.mubr.msk.f32.mxu0 %vm257_vm0, %v5642_v20  ;;  %v4062_v20 = vld [vmem:[%s7083_s2 + $0x20] sm:$0xff] }
  0x80   : > { %4766 = vmatmul.mubr.msk.f32.gmra.mrb[46].mxu1 %vm257_vm0, %v5829_v9 }
  0x82   : > { %4787 = vmatmul.mubr.msk.f32.vlgmr.msra.gmra.mrb[48].mxu0 %vm257_vm0, %v5674_v32  ;;  %v4063_v32 = vld [vmem:[%s7083_s2 + $0x28] sm:$0xff] }
  0x83   : > { %4789 = vmatprep.mubr.msk.f32.mxu0 %vm257_vm0, %v5685_v35  ;;  %v5510_v35 = vmov 0.0|0.0  }
  0x84   : > { %5256 = vmatprep.subr.bf16.mxu1 %v5510_v35  ;;  %5268 = vmatprep.subr.bf16.mxu0 %v5510_v35 }
  0x86   : > { %4790 = vmatmul.mubr.msk.f32.gmra.mrb[50].mxu0 %vm257_vm0, %v5697_v40  ;;  %v5257_v40 = vpack.c.bf16 %v4063_v32, %v4062_v20 }
  0x87   : > { %4792 = vmatprep.mubr.msk.f32.mxu0 %vm257_vm0, %v5710_v43  ;;  %v4076_v43 = vld [vmem:[%s7083_s2 + $0x40] sm:$0xff] }
  0x88   : > { %5258 = vmatpush3.bf16.msra.mxu1 %v5257_v40 }
  0x89   : > { %5259 = vmatprep.subr.bf16.mxu1 %v5510_v35 }
  0x8a   : > { %4793 = vmatmul.mubr.msk.f32.gmra.mrb[52].mxu0 %vm257_vm0, %v5725_v48  ;;  %v4077_v48 = vld [vmem:[%s7083_s2 + $0x48] sm:$0xff] }
  0x8b   : > { %4795 = vmatprep.mubr.msk.f32.mxu0 %vm257_vm0, %v5736_v51  ;;  %v5269_v49 = vpack.c.bf16 %v4077_v48, %v4076_v43  ;;  %v4065_v51 = vld [vmem:[%s7083_s2 + $0x38] sm:$0xff] }
  0x8c   : > { %v5260_v53 = vpack.c.bf16 %v4065_v51, %v4064_v50 }
  0x8d   : > { %5270 = vmatpush3.bf16.msra.mxu0 %v5269_v49 }
  0x8e   : > { %4796 = vmatmul.mubr.msk.f32.gmra.mrb[54].mxu0 %vm257_vm0, %v5745_v54  ;;  %5271 = vmatprep.subr.bf16.mxu0 %v5510_v35  ;;  %v4079_v54 = vld [vmem:[%s7083_s2 + $0x58] sm:$0xff] }
  0x8f   : > { %4798 = vmatprep.mubr.msk.f32.mxu0 %vm257_vm0, %v5756_v57  ;;  %v5272_v55 = vpack.c.bf16 %v4079_v54, %v4078_v52  ;;  %5261 = vmatpush3.bf16.msra.mxu1 %v5260_v53  ;;  %v5512_v57 = vmov 0.0  }
  0x90   : > { %5262 = vmatprep.subr.bf16.mxu1 %v5510_v35  ;;  %4818 = vmatprep.mubr.msk.f32.mxu1 %vm5511_vm2, %v5512_v57 }
  0x91   : > { %5273 = vmatpush3.bf16.msra.mxu0 %v5272_v55 }
  0x92   : > { %4799 = vmatmul.mubr.msk.f32.gmra.mrb[56].mxu0 %vm257_vm0, %v5774_v62  ;;  %5280 = vmatprep.subr.bf16.mxu0 %v5510_v35 }
  0x93   : > { %4801 = vmatprep.mubr.msk.f32.mxu0 %vm257_vm0, %v5779_v63 }
  0x96   : > { %4802 = vmatmul.mubr.msk.f32.gmra.mrb[58].mxu0 %vm257_vm0, %v5787_v1 }
  0x97   : > { %4804 = vmatprep.mubr.msk.f32.mxu0 %vm257_vm0, %v5804_v5 }
  0x9a   : > { %4805 = vmatmul.mubr.msk.f32.gmra.mrb[60].mxu0 %vm257_vm0, %v5814_v7 }
  0x9b   : > { %4807 = vmatprep.mubr.msk.f32.mxu0 %vm257_vm0, %v5819_v8 }
  0x9e   : > { %4808 = vmatmul.mubr.msk.f32.gmra.mrb[62].mxu0 %vm257_vm0, %v5829_v9 }
  0x9f   : > { %4864 = vmatprep.mubr.msk.f32.mxu0 %vm5511_vm2, %v5512_v57 }
  0xf5   : > { %v4536_v59 = vpop.f32.mrb[0].mxu0 }
  0xf6   : > { %v456_v60 = vrot.slane %v4536_v59, 1  ;;  %v376_v61 = vpop.f32.mrb[1].mxu0 }
  0xf7   : > { %v455_v62 = vrot.slane %v376_v61, 1  ;;  %v4578_v63 = vpop.f32.mrb[0].mxu1 }
  0xf8   : > { %v559_v0 = vpop.f32.mrb[1].mxu1 }
  0xf9   : > { %v4539_v1 = vpop.f32.mrb[2].mxu0  ;;  %v488_v2 = vsel %vm473_vm3, %v455_v62, %v456_v60 }
  0xfa   : > { %v458_v3 = vrot.slane %v4539_v1, 1  ;;  %v6113_v4 = vadd.f32 %v559_v0, %v488_v2  ;;  %v386_v5 = vpop.f32.mrb[3].mxu0 }
  0xfb   : > { %v457_v6 = vrot.slane %v386_v5, 1  ;;  %v4581_v7 = vpop.f32.mrb[2].mxu1 }
  0xfc   : > { %v569_v8 = vpop.f32.mrb[3].mxu1 }
  0xfd   : > { %v487_v9 = vsel %vm473_vm3, %v456_v60, %v457_v6  ;;  %v4542_v10 = vpop.f32.mrb[4].mxu0  ;;  %v486_v11 = vsel %vm473_vm3, %v457_v6, %v458_v3 }
  0xfe   : > { %v6119_v12 = vadd.f32 %v4578_v63, %v487_v9  ;;  %v460_v13 = vrot.slane %v4542_v10, 1  ;;  %v6121_v14 = vadd.f32 %v569_v8, %v486_v11  ;;  %v396_v15 = vpop.f32.mrb[5].mxu0 }
  0xff   : > { %v459_v16 = vrot.slane %v396_v15, 1  ;;  %v4584_v17 = vpop.f32.mrb[4].mxu1 }
 0x100   : > { %v579_v18 = vpop.f32.mrb[5].mxu1 }
 0x101   : > { %v485_v19 = vsel %vm473_vm3, %v458_v3, %v459_v16  ;;  %v4545_v21 = vpop.f32.mrb[6].mxu0  ;;  %v484_v22 = vsel %vm473_vm3, %v459_v16, %v460_v13 }
 0x102   : > { %v6127_v23 = vadd.f32 %v4581_v7, %v485_v19  ;;  %v462_v24 = vrot.slane %v4545_v21, 1  ;;  %v6129_v25 = vadd.f32 %v579_v18, %v484_v22  ;;  %v406_v26 = vpop.f32.mrb[7].mxu0 }
 0x103   : > { %v461_v27 = vrot.slane %v406_v26, 1  ;;  %v4587_v28 = vpop.f32.mrb[6].mxu1 }
 0x104   : > { %v589_v29 = vpop.f32.mrb[7].mxu1 }
 0x105   : > { %v483_v30 = vsel %vm473_vm3, %v460_v13, %v461_v27  ;;  %v4548_v31 = vpop.f32.mrb[8].mxu0  ;;  %v482_v33 = vsel %vm473_vm3, %v461_v27, %v462_v24 }
 0x106   : > { %v6135_v34 = vadd.f32 %v4584_v17, %v483_v30  ;;  %v464_v36 = vrot.slane %v4548_v31, 1  ;;  %v6137_v37 = vadd.f32 %v589_v29, %v482_v33  ;;  %v416_v38 = vpop.f32.mrb[9].mxu0 }
 0x107   : > { %v463_v39 = vrot.slane %v416_v38, 1  ;;  %v4590_v41 = vpop.f32.mrb[8].mxu1 }
 0x108   : > { %v599_v42 = vpop.f32.mrb[9].mxu1 }
 0x109   : > { %v481_v44 = vsel %vm473_vm3, %v462_v24, %v463_v39  ;;  %v4551_v45 = vpop.f32.mrb[10].mxu0  ;;  %v480_v46 = vsel %vm473_vm3, %v463_v39, %v464_v36 }
 0x10a   : > { %v6143_v47 = vadd.f32 %v4587_v28, %v481_v44  ;;  %v466_v20 = vrot.slane %v4551_v45, 1  ;;  %v6145_v32 = vadd.f32 %v599_v42, %v480_v46  ;;  %v426_v40 = vpop.f32.mrb[11].mxu0 }
 0x10b   : > { %v465_v43 = vrot.slane %v426_v40, 1  ;;  %v4593_v48 = vpop.f32.mrb[10].mxu1 }
 0x10c   : > { %v609_v49 = vpop.f32.mrb[11].mxu1 }
 0x10d   : > { %v479_v50 = vsel %vm473_vm3, %v464_v36, %v465_v43  ;;  %v4554_v51 = vpop.f32.mrb[12].mxu0  ;;  %v478_v52 = vsel %vm473_vm3, %v465_v43, %v466_v20 }
 0x10e   : > { %v6151_v53 = vadd.f32 %v4590_v41, %v479_v50  ;;  %v468_v54 = vrot.slane %v4554_v51, 1  ;;  %v6153_v55 = vadd.f32 %v609_v49, %v478_v52  ;;  %v436_v56 = vpop.f32.mrb[13].mxu0 }
 0x10f   : > { %v467_v59 = vrot.slane %v436_v56, 1  ;;  %v4596_v60 = vpop.f32.mrb[12].mxu1 }
 0x110   : > { %v619_v61 = vpop.f32.mrb[13].mxu1 }
 0x111   : > { %v477_v62 = vsel %vm473_vm3, %v466_v20, %v467_v59  ;;  %v4557_v63 = vpop.f32.mrb[14].mxu0  ;;  %v476_v0 = vsel %vm473_vm3, %v467_v59, %v468_v54 }
 0x112   : > { %v6159_v1 = vadd.f32 %v4593_v48, %v477_v62  ;;  %v470_v2 = vrot.slane %v4557_v63, 1  ;;  %v6161_v3 = vadd.f32 %v619_v61, %v476_v0  ;;  %v446_v5 = vpop.f32.mrb[15].mxu0 }
 0x113   : > { %v469_v6 = vrot.slane %v446_v5, 1  ;;  %v4599_v7 = vpop.f32.mrb[14].mxu1 }
 0x114   : > { %v629_v8 = vpop.f32.mrb[15].mxu1 }
 0x115   : > { %v475_v9 = vsel %vm473_vm3, %v468_v54, %v469_v6  ;;  %v474_v10 = vsel %vm473_vm3, %v469_v6, %v470_v2  ;;  %v4620_v11 = vpop.f32.mrb[16].mxu0 }
 0x116   : > { %v6167_v13 = vadd.f32 %v4596_v60, %v475_v9  ;;  %v6169_v15 = vadd.f32 %v629_v8, %v474_v10  ;;  %v797_v16 = vrot.slane %v4620_v11, 2  ;;  %v717_v17 = vpop.f32.mrb[17].mxu0 }
 0x117   : > { %v796_v18 = vrot.slane %v717_v17, 2  ;;  %v4662_v19 = vpop.f32.mrb[16].mxu1 }
 0x118   : > { %v1004_v21 = vrot.slane %v4662_v19, 3  ;;  %v924_v22 = vpop.f32.mrb[17].mxu1 }
 0x119   : > { %v827_v24 = vsel %vm812_vm4, %v796_v18, %v797_v16  ;;  %v1003_v26 = vrot.slane %v924_v22, 3  ;;  %v4623_v27 = vpop.f32.mrb[18].mxu0 }
 0x11a   : > { %v829_v28 = vadd.f32 %v827_v24, %v6113_v4  ;;  %v799_v29 = vrot.slane %v4623_v27, 2  ;;  %v727_v30 = vpop.f32.mrb[19].mxu0 }
 0x11b   : > { %v1034_v31 = vsel %vm1019_vm5, %v1003_v26, %v1004_v21  ;;  %v798_v33 = vrot.slane %v727_v30, 2  ;;  %v4665_v36 = vpop.f32.mrb[18].mxu1 }
 0x11c   : > { %v6178_v38 = vadd.f32 %v1034_v31, %v829_v28  ;;  %v1006_v39 = vrot.slane %v4665_v36, 3  ;;  %v934_v41 = vpop.f32.mrb[19].mxu1 }
 0x11d   : > { %v825_v42 = vsel %vm812_vm4, %v798_v33, %v799_v29  ;;  %v826_v44 = vsel %vm812_vm4, %v797_v16, %v798_v33  ;;  %v1005_v45 = vrot.slane %v934_v41, 3  ;;  %v4626_v46 = vpop.f32.mrb[20].mxu0 }
 0x11e   : > { %v830_v4 = vadd.f32 %v826_v44, %v6119_v12  ;;  %v831_v20 = vadd.f32 %v825_v42, %v6121_v14  ;;  %v801_v40 = vrot.slane %v4626_v46, 2  ;;  %v737_v43 = vpop.f32.mrb[21].mxu0 }
 0x11f   : > { %v1032_v48 = vsel %vm1019_vm5, %v1005_v45, %v1006_v39  ;;  %v1033_v49 = vsel %vm1019_vm5, %v1004_v21, %v1005_v45  ;;  %v800_v50 = vrot.slane %v737_v43, 2  ;;  %v4668_v51 = vpop.f32.mrb[20].mxu1 }
 0x120   : > { %v6190_v52 = vadd.f32 %v1033_v49, %v830_v4  ;;  %v6192_v54 = vadd.f32 %v1032_v48, %v831_v20  ;;  %v1008_v56 = vrot.slane %v4668_v51, 3  ;;  %v944_v59 = vpop.f32.mrb[21].mxu1 }
 0x121   : > { %v823_v12 = vsel %vm812_vm4, %v800_v50, %v801_v40  ;;  %v824_v14 = vsel %vm812_vm4, %v799_v29, %v800_v50  ;;  %v1007_v60 = vrot.slane %v944_v59, 3  ;;  %v4629_v61 = vpop.f32.mrb[22].mxu0 }
 0x122   : > { %v832_v62 = vadd.f32 %v824_v14, %v6127_v23  ;;  %v833_v63 = vadd.f32 %v823_v12, %v6129_v25  ;;  %v803_v0 = vrot.slane %v4629_v61, 2  ;;  %v747_v2 = vpop.f32.mrb[23].mxu0 }
 0x123   : > { %v1030_v5 = vsel %vm1019_vm5, %v1007_v60, %v1008_v56  ;;  %v1031_v6 = vsel %vm1019_vm5, %v1006_v39, %v1007_v60  ;;  %v802_v7 = vrot.slane %v747_v2, 2  ;;  %v4671_v8 = vpop.f32.mrb[22].mxu1 }
 0x124   : > { %v6204_v9 = vadd.f32 %v1031_v6, %v832_v62  ;;  %v6206_v10 = vadd.f32 %v1030_v5, %v833_v63  ;;  %v1010_v11 = vrot.slane %v4671_v8, 3  ;;  %v954_v16 = vpop.f32.mrb[23].mxu1 }
 0x125   : > { %v821_v23 = vsel %vm812_vm4, %v802_v7, %v803_v0  ;;  %v822_v25 = vsel %vm812_vm4, %v801_v40, %v802_v7  ;;  %v1009_v17 = vrot.slane %v954_v16, 3  ;;  %v4632_v18 = vpop.f32.mrb[24].mxu0 }
 0x126   : > { %v834_v19 = vadd.f32 %v822_v25, %v6135_v34  ;;  %v835_v21 = vadd.f32 %v821_v23, %v6137_v37  ;;  %v805_v22 = vrot.slane %v4632_v18, 2  ;;  %v757_v24 = vpop.f32.mrb[25].mxu0 }
 0x127   : > { %v1028_v26 = vsel %vm1019_vm5, %v1009_v17, %v1010_v11  ;;  %v1029_v27 = vsel %vm1019_vm5, %v1008_v56, %v1009_v17  ;;  %v804_v28 = vrot.slane %v757_v24, 2  ;;  %v4674_v29 = vpop.f32.mrb[24].mxu1 }
 0x128   : > { %v6218_v30 = vadd.f32 %v1029_v27, %v834_v19  ;;  %v6220_v31 = vadd.f32 %v1028_v26, %v835_v21  ;;  %v1012_v33 = vrot.slane %v4674_v29, 3  ;;  %v964_v36 = vpop.f32.mrb[25].mxu1 }
 0x129   : > { %v819_v34 = vsel %vm812_vm4, %v804_v28, %v805_v22  ;;  %v820_v37 = vsel %vm812_vm4, %v803_v0, %v804_v28  ;;  %v1011_v39 = vrot.slane %v964_v36, 3  ;;  %v4635_v41 = vpop.f32.mrb[26].mxu0 }
 0x12a   : > { %v836_v42 = vadd.f32 %v820_v37, %v6143_v47  ;;  %v837_v44 = vadd.f32 %v819_v34, %v6145_v32  ;;  %v807_v45 = vrot.slane %v4635_v41, 2  ;;  %v767_v46 = vpop.f32.mrb[27].mxu0 }
 0x12b   : > { %v1026_v4 = vsel %vm1019_vm5, %v1011_v39, %v1012_v33  ;;  %v1027_v20 = vsel %vm1019_vm5, %v1010_v11, %v1011_v39  ;;  %v806_v40 = vrot.slane %v767_v46, 2  ;;  %v4677_v43 = vpop.f32.mrb[26].mxu1 }
 0x12c   : > { %v6232_v48 = vadd.f32 %v1027_v20, %v836_v42  ;;  %v6234_v49 = vadd.f32 %v1026_v4, %v837_v44  ;;  %v1014_v50 = vrot.slane %v4677_v43, 3  ;;  %v974_v51 = vpop.f32.mrb[27].mxu1 }
 0x12d   : > { %v817_v47 = vsel %vm812_vm4, %v806_v40, %v807_v45  ;;  %v818_v32 = vsel %vm812_vm4, %v805_v22, %v806_v40  ;;  %v1013_v56 = vrot.slane %v974_v51, 3  ;;  %v4638_v59 = vpop.f32.mrb[28].mxu0 }
 0x12e   : > { %v838_v12 = vadd.f32 %v818_v32, %v6151_v53  ;;  %v839_v14 = vadd.f32 %v817_v47, %v6153_v55  ;;  %v809_v60 = vrot.slane %v4638_v59, 2  ;;  %v777_v61 = vpop.f32.mrb[29].mxu0 }
 0x12f   : > { %v1024_v62 = vsel %vm1019_vm5, %v1013_v56, %v1014_v50  ;;  %v1025_v63 = vsel %vm1019_vm5, %v1012_v33, %v1013_v56  ;;  %v808_v0 = vrot.slane %v777_v61, 2  ;;  %v4680_v2 = vpop.f32.mrb[28].mxu1 }
 0x130   : > { %v6246_v5 = vadd.f32 %v1025_v63, %v838_v12  ;;  %v6248_v6 = vadd.f32 %v1024_v62, %v839_v14  ;;  %v1016_v7 = vrot.slane %v4680_v2, 3  ;;  %v984_v8 = vpop.f32.mrb[29].mxu1 }
 0x131   : > { %v815_v53 = vsel %vm812_vm4, %v808_v0, %v809_v60  ;;  %v816_v55 = vsel %vm812_vm4, %v807_v45, %v808_v0  ;;  %v1015_v11 = vrot.slane %v984_v8, 3  ;;  %v4641_v16 = vpop.f32.mrb[30].mxu0 }
 0x132   : > { %v840_v23 = vadd.f32 %v816_v55, %v6159_v1  ;;  %v841_v25 = vadd.f32 %v815_v53, %v6161_v3  ;;  %v811_v17 = vrot.slane %v4641_v16, 2  ;;  %v787_v18 = vpop.f32.mrb[31].mxu0 }
 0x133   : > { %v1022_v19 = vsel %vm1019_vm5, %v1015_v11, %v1016_v7  ;;  %v1023_v21 = vsel %vm1019_vm5, %v1014_v50, %v1015_v11  ;;  %v810_v22 = vrot.slane %v787_v18, 2  ;;  %v4683_v24 = vpop.f32.mrb[30].mxu1 }
 0x134   : > { %v6261_v26 = vadd.f32 %v1023_v21, %v840_v23  ;;  %v6263_v27 = vadd.f32 %v1022_v19, %v841_v25  ;;  %v1018_v28 = vrot.slane %v4683_v24, 3  ;;  %v994_v1 = vpop.f32.mrb[31].mxu1 }
 0x135   : > { %v813_v3 = vsel %vm812_vm4, %v810_v22, %v811_v17  ;;  %v814_v29 = vsel %vm812_vm4, %v809_v60, %v810_v22  ;;  %v1017_v33 = vrot.slane %v994_v1, 3  ;;  %v4704_v36 = vpop.f32.mrb[32].mxu0 }
 0x136   : > { %v842_v34 = vadd.f32 %v814_v29, %v6167_v13  ;;  %v843_v37 = vadd.f32 %v813_v3, %v6169_v15  ;;  %v1211_v39 = vrot.slane %v4704_v36, 4  ;;  %v1131_v41 = vpop.f32.mrb[33].mxu0 }
 0x137   : > { %v1020_v42 = vsel %vm1019_vm5, %v1017_v33, %v1018_v28  ;;  %v1021_v44 = vsel %vm1019_vm5, %v1016_v7, %v1017_v33  ;;  %v1210_v45 = vrot.slane %v1131_v41, 4  ;;  %v4746_v46 = vpop.f32.mrb[32].mxu1 }
 0x138   : > { %v6275_v4 = vadd.f32 %v1021_v44, %v842_v34  ;;  %v6277_v20 = vadd.f32 %v1020_v42, %v843_v37  ;;  %v1418_v40 = vrot.slane %v4746_v46, 5  ;;  %v1338_v43 = vpop.f32.mrb[33].mxu1 }
 0x139   : > { %v1241_v13 = vsel %vm1226_vm6, %v1210_v45, %v1211_v39  ;;  %v1417_v15 = vrot.slane %v1338_v43, 5  ;;  %v4707_v50 = vpop.f32.mrb[34].mxu0 }
 0x13a   : > { %v1243_v51 = vadd.f32 %v1241_v13, %v6178_v38  ;;  %v1213_v47 = vrot.slane %v4707_v50, 4  ;;  %v1141_v32 = vpop.f32.mrb[35].mxu0 }
 0x13b   : > { %v1448_v56 = vsel %vm1433_vm7, %v1417_v15, %v1418_v40  ;;  %v1212_v59 = vrot.slane %v1141_v32, 4  ;;  %v4749_v12 = vpop.f32.mrb[34].mxu1 }
 0x13c   : > { %v6285_v14 = vadd.f32 %v1448_v56, %v1243_v51  ;;  %v1420_v60 = vrot.slane %v4749_v12, 5  ;;  %v1348_v61 = vpop.f32.mrb[35].mxu1 }
 0x13d   : > { %v1239_v62 = vsel %vm1226_vm6, %v1212_v59, %v1213_v47  ;;  %v1240_v63 = vsel %vm1226_vm6, %v1211_v39, %v1212_v59  ;;  %v1419_v0 = vrot.slane %v1348_v61, 5  ;;  %v4710_v2 = vpop.f32.mrb[36].mxu0 }
 0x13e   : > { %v1244_v38 = vadd.f32 %v1240_v63, %v6190_v52  ;;  %v1245_v7 = vadd.f32 %v1239_v62, %v6192_v54  ;;  %v1215_v8 = vrot.slane %v4710_v2, 4  ;;  %v1151_v53 = vpop.f32.mrb[37].mxu0 }
 0x13f   : > { %v1446_v55 = vsel %vm1433_vm7, %v1419_v0, %v1420_v60  ;;  %v1447_v11 = vsel %vm1433_vm7, %v1418_v40, %v1419_v0  ;;  %v1214_v16 = vrot.slane %v1151_v53, 4  ;;  %v4752_v23 = vpop.f32.mrb[36].mxu1 }
 0x140   : > { %v6297_v25 = vadd.f32 %v1447_v11, %v1244_v38  ;;  %v6299_v17 = vadd.f32 %v1446_v55, %v1245_v7  ;;  %v1422_v18 = vrot.slane %v4752_v23, 5  ;;  %v1358_v19 = vpop.f32.mrb[37].mxu1 }
 0x141   : > { %v1237_v52 = vsel %vm1226_vm6, %v1214_v16, %v1215_v8  ;;  %v1238_v54 = vsel %vm1226_vm6, %v1213_v47, %v1214_v16  ;;  %v1421_v21 = vrot.slane %v1358_v19, 5  ;;  %v4713_v22 = vpop.f32.mrb[38].mxu0 }
 0x142   : > { %v1246_v24 = vadd.f32 %v1238_v54, %v6204_v9  ;;  %v1247_v28 = vadd.f32 %v1237_v52, %v6206_v10  ;;  %v1217_v1 = vrot.slane %v4713_v22, 4  ;;  %v1161_v3 = vpop.f32.mrb[39].mxu0 }
 0x143   : > { %v1444_v29 = vsel %vm1433_vm7, %v1421_v21, %v1422_v18  ;;  %v1445_v33 = vsel %vm1433_vm7, %v1420_v60, %v1421_v21  ;;  %v1216_v36 = vrot.slane %v1161_v3, 4  ;;  %v4755_v34 = vpop.f32.mrb[38].mxu1 }
 0x144   : > { %v6311_v37 = vadd.f32 %v1445_v33, %v1246_v24  ;;  %v6313_v39 = vadd.f32 %v1444_v29, %v1247_v28  ;;  %v1424_v41 = vrot.slane %v4755_v34, 5  ;;  %v1368_v42 = vpop.f32.mrb[39].mxu1 }
 0x145   : > { %v1235_v9 = vsel %vm1226_vm6, %v1216_v36, %v1217_v1  ;;  %v1236_v10 = vsel %vm1226_vm6, %v1215_v8, %v1216_v36  ;;  %v1423_v44 = vrot.slane %v1368_v42, 5  ;;  %v4716_v45 = vpop.f32.mrb[40].mxu0 }
 0x146   : > { %v1248_v46 = vadd.f32 %v1236_v10, %v6218_v30  ;;  %v1249_v40 = vadd.f32 %v1235_v9, %v6220_v31  ;;  %v1219_v43 = vrot.slane %v4716_v45, 4  ;;  %v1171_v13 = vpop.f32.mrb[41].mxu0 }
 0x147   : > { %v1442_v15 = vsel %vm1433_vm7, %v1423_v44, %v1424_v41  ;;  %v1443_v50 = vsel %vm1433_vm7, %v1422_v18, %v1423_v44  ;;  %v1218_v51 = vrot.slane %v1171_v13, 4  ;;  %v4758_v47 = vpop.f32.mrb[40].mxu1 }
 0x148   : > { %v6325_v32 = vadd.f32 %v1443_v50, %v1248_v46  ;;  %v6327_v56 = vadd.f32 %v1442_v15, %v1249_v40  ;;  %v1426_v59 = vrot.slane %v4758_v47, 5  ;;  %v1378_v12 = vpop.f32.mrb[41].mxu1 }
 0x149   : > { %v1233_v30 = vsel %vm1226_vm6, %v1218_v51, %v1219_v43  ;;  %v1234_v31 = vsel %vm1226_vm6, %v1217_v1, %v1218_v51  ;;  %v1425_v60 = vrot.slane %v1378_v12, 5  ;;  %v4719_v61 = vpop.f32.mrb[42].mxu0 }
 0x14a   : > { %v1250_v62 = vadd.f32 %v1234_v31, %v6232_v48  ;;  %v1251_v63 = vadd.f32 %v1233_v30, %v6234_v49  ;;  %v1221_v0 = vrot.slane %v4719_v61, 4  ;;  %v1181_v2 = vpop.f32.mrb[43].mxu0 }
 0x14b   : > { %v1440_v38 = vsel %vm1433_vm7, %v1425_v60, %v1426_v59  ;;  %v1441_v7 = vsel %vm1433_vm7, %v1424_v41, %v1425_v60  ;;  %v1220_v8 = vrot.slane %v1181_v2, 4  ;;  %v4761_v53 = vpop.f32.mrb[42].mxu1 }
 0x14c   : > { %v6339_v55 = vadd.f32 %v1441_v7, %v1250_v62  ;;  %v6341_v11 = vadd.f32 %v1440_v38, %v1251_v63  ;;  %v1428_v16 = vrot.slane %v4761_v53, 5  ;;  %v1388_v23 = vpop.f32.mrb[43].mxu1 }
 0x14d   : > { %v1231_v48 = vsel %vm1226_vm6, %v1220_v8, %v1221_v0  ;;  %v1232_v49 = vsel %vm1226_vm6, %v1219_v43, %v1220_v8  ;;  %v1427_v18 = vrot.slane %v1388_v23, 5  ;;  %v4722_v19 = vpop.f32.mrb[44].mxu0 }
 0x14e   : > { %v1252_v52 = vadd.f32 %v1232_v49, %v6246_v5  ;;  %v1253_v54 = vadd.f32 %v1231_v48, %v6248_v6  ;;  %v1223_v21 = vrot.slane %v4722_v19, 4  ;;  %v1191_v22 = vpop.f32.mrb[45].mxu0 }
 0x14f   : > { %v1438_v24 = vsel %vm1433_vm7, %v1427_v18, %v1428_v16  ;;  %v1439_v28 = vsel %vm1433_vm7, %v1426_v59, %v1427_v18  ;;  %v1222_v1 = vrot.slane %v1191_v22, 4  ;;  %v4764_v3 = vpop.f32.mrb[44].mxu1 }
 0x150   : > { %v6353_v29 = vadd.f32 %v1439_v28, %v1252_v52  ;;  %v6355_v33 = vadd.f32 %v1438_v24, %v1253_v54  ;;  %v1430_v36 = vrot.slane %v4764_v3, 5  ;;  %v1398_v34 = vpop.f32.mrb[45].mxu1 }
 0x151   : > { %v1229_v5 = vsel %vm1226_vm6, %v1222_v1, %v1223_v21  ;;  %v1230_v6 = vsel %vm1226_vm6, %v1221_v0, %v1222_v1  ;;  %v1429_v41 = vrot.slane %v1398_v34, 5  ;;  %v4725_v42 = vpop.f32.mrb[46].mxu0 }
 0x152   : > { %v1254_v9 = vadd.f32 %v1230_v6, %v6261_v26  ;;  %v1255_v10 = vadd.f32 %v1229_v5, %v6263_v27  ;;  %v1225_v44 = vrot.slane %v4725_v42, 4  ;;  %v1201_v45 = vpop.f32.mrb[47].mxu0 }
 0x153   : > { %v1436_v46 = vsel %vm1433_vm7, %v1429_v41, %v1430_v36  ;;  %v1437_v40 = vsel %vm1433_vm7, %v1428_v16, %v1429_v41  ;;  %v1224_v43 = vrot.slane %v1201_v45, 4  ;;  %v4767_v13 = vpop.f32.mrb[46].mxu1 }
 0x154   : > { %v6368_v15 = vadd.f32 %v1437_v40, %v1254_v9  ;;  %v6370_v50 = vadd.f32 %v1436_v46, %v1255_v10  ;;  %v1432_v51 = vrot.slane %v4767_v13, 5  ;;  %v1408_v26 = vpop.f32.mrb[47].mxu1 }
 0x155   : > { %v1227_v27 = vsel %vm1226_vm6, %v1224_v43, %v1225_v44  ;;  %v1228_v47 = vsel %vm1226_vm6, %v1223_v21, %v1224_v43  ;;  %v1431_v59 = vrot.slane %v1408_v26, 5  ;;  %v4788_v12 = vpop.f32.mrb[48].mxu0 }
 0x156   : > { %v1256_v30 = vadd.f32 %v1228_v47, %v6275_v4  ;;  %v1257_v31 = vadd.f32 %v1227_v27, %v6277_v20  ;;  %v1625_v60 = vrot.slane %v4788_v12, 6  ;;  %v1545_v61 = vpop.f32.mrb[49].mxu0  ;;  %v6391_v4 = vld [vmem:[%s7085_s4] ss:$0 sm:$0xff] }
 0x157   : > { %v1434_v62 = vsel %vm1433_vm7, %v1431_v59, %v1432_v51  ;;  %v1435_v63 = vsel %vm1433_vm7, %v1430_v36, %v1431_v59  ;;  %v1624_v0 = vrot.slane %v1545_v61, 6 }
 0x158   : > { %v6382_v2 = vadd.f32 %v1435_v63, %v1256_v30  ;;  %v6384_v38 = vadd.f32 %v1434_v62, %v1257_v31  ;;  %v1767_v63 = vld [vmem:[%s7083_s2] sm:$0xff] }
 0x159   : > { %v1655_v7 = vsel %vm1640_vm8, %v1624_v0, %v1625_v60  ;;  %v4791_v20 = vpop.f32.mrb[50].mxu0  ;;  %v1768_v0 = vld [vmem:[%s7083_s2 + $0x8] sm:$0xff] }
 0x15a   : > { %v1657_v8 = vadd.f32 %v1655_v7, %v6285_v14  ;;  %v1627_v53 = vrot.slane %v4791_v20, 6  ;;  %v1555_v16 = vpop.f32.mrb[51].mxu0 }
 0x15b   : > { %v1626_v23 = vrot.slane %v1555_v16, 6 }
 0x15c   : > { %v1678_v48 = vadd.f32 %v6391_v4, %v1657_v8 }
 0x15d   : > { %v1653_v49 = vsel %vm1640_vm8, %v1626_v23, %v1627_v53  ;;  %v1654_v18 = vsel %vm1640_vm8, %v1625_v60, %v1626_v23  ;;  %v4794_v19 = vpop.f32.mrb[52].mxu0  ;;  %v4094_v23 = vld [vmem:[%s7083_s2 + $0x80] sm:$0xff] }
 0x15e   : > { %v1694_v52 = vmax.f32 %v1678_v48, 0.0  ;;  %v1658_v54 = vadd.f32 %v1654_v18, %v6297_v25  ;;  %v1659_v21 = vadd.f32 %v1653_v49, %v6299_v17  ;;  %v1629_v22 = vrot.slane %v4794_v19, 6  ;;  %v1565_v14 = vpop.f32.mrb[53].mxu0  ;;  %v4095_v48 = vld [vmem:[%s7083_s2 + $0x88] sm:$0xff] }
 0x15f   : > { %v1628_v24 = vrot.slane %v1565_v14, 6 }
 0x160   : > { %1711 = vst.msk [vmem:[#allocation2] sm:$0xff] %vm1710_vm9, %v1694_v52  ;;  %v1679_v28 = vadd.f32 %v6391_v4, %v1658_v54  ;;  %v1680_v1 = vadd.f32 %v6391_v4, %v1659_v21  ;;  %v5263_v52 = vpack.c.bf16 %v1768_v0, %v1767_v63 }
 0x161   : > { %v1651_v3 = vsel %vm1640_vm8, %v1628_v24, %v1629_v22  ;;  %v1652_v36 = vsel %vm1640_vm8, %v1627_v53, %v1628_v24  ;;  %v4797_v34 = vpop.f32.mrb[54].mxu0 }
 0x162   : > { %v1695_v5 = vmax.f32 %v1679_v28, 0.0  ;;  %v1696_v25 = vmax.f32 %v1680_v1, 0.0  ;;  %v1660_v17 = vadd.f32 %v1652_v36, %v6311_v37  ;;  %v1661_v6 = vadd.f32 %v1651_v3, %v6313_v39  ;;  %v1575_v41 = vpop.f32.mrb[55].mxu0 }
 0x163   : > { %v1631_v42 = vrot.slane %v4797_v34, 6  ;;  %v1630_v9 = vrot.slane %v1575_v41, 6  ;;  %v1769_v34 = vld [vmem:[%s7083_s2 + $0x10] sm:$0xff] }
 0x164   : > { %1712 = vst.msk [vmem:[#allocation2 + $0x8] sm:$0xff] %vm1710_vm9, %v1695_v5  ;;  %1713 = vst.msk [vmem:[#allocation2 + $0x10] sm:$0xff] %vm1710_vm9, %v1696_v25  ;;  %v1681_v10 = vadd.f32 %v6391_v4, %v1660_v17  ;;  %v1682_v44 = vadd.f32 %v6391_v4, %v1661_v6  ;;  %v5281_v5 = vpack.c.bf16 %v4095_v48, %v4094_v23  ;;  %v4096_v17 = vld [vmem:[%s7083_s2 + $0x90] sm:$0xff]  ;;  %v4097_v6 = vld [vmem:[%s7083_s2 + $0x98] sm:$0xff] }
 0x165   : > { %v1649_v45 = vsel %vm1640_vm8, %v1630_v9, %v1631_v42  ;;  %v1650_v46 = vsel %vm1640_vm8, %v1629_v22, %v1630_v9  ;;  %v4800_v37 = vpop.f32.mrb[56].mxu0 }
 0x166   : > { %v1697_v40 = vmax.f32 %v1681_v10, 0.0  ;;  %v1698_v39 = vmax.f32 %v1682_v44, 0.0  ;;  %v1662_v43 = vadd.f32 %v1650_v46, %v6325_v32  ;;  %v1663_v13 = vadd.f32 %v1649_v45, %v6327_v56  ;;  %v1585_v51 = vpop.f32.mrb[57].mxu0 }
 0x167   : > { %v1633_v26 = vrot.slane %v4800_v37, 6  ;;  %v1632_v27 = vrot.slane %v1585_v51, 6 }
 0x168   : > { %1714 = vst.msk [vmem:[#allocation2 + $0x18] sm:$0xff] %vm1710_vm9, %v1697_v40  ;;  %1715 = vst.msk [vmem:[#allocation2 + $0x20] sm:$0xff] %vm1710_vm9, %v1698_v39  ;;  %v1683_v47 = vadd.f32 %v6391_v4, %v1662_v43  ;;  %v1684_v59 = vadd.f32 %v6391_v4, %v1663_v13 }
 0x169   : > { %v1647_v12 = vsel %vm1640_vm8, %v1632_v27, %v1633_v26  ;;  %v1648_v30 = vsel %vm1640_vm8, %v1631_v42, %v1632_v27  ;;  %v4803_v32 = vpop.f32.mrb[58].mxu0 }
 0x16a   : > { %v1699_v31 = vmax.f32 %v1683_v47, 0.0  ;;  %v1700_v56 = vmax.f32 %v1684_v59, 0.0  ;;  %v1664_v60 = vadd.f32 %v1648_v30, %v6339_v55  ;;  %v1665_v61 = vadd.f32 %v1647_v12, %v6341_v11  ;;  %v1595_v62 = vpop.f32.mrb[59].mxu0 }
 0x16b   : > { %v1635_v7 = vrot.slane %v4803_v32, 6  ;;  %v1634_v20 = vrot.slane %v1595_v62, 6  ;;  %v1728_v8 = vld [vmem:[#allocation2] ss:$3 sm:$0xff]  ;;  %v1738_v53 = vld [vmem:[#allocation2 + $0x1] ss:$3 sm:$0xff] }
 0x16c   : > { %1716 = vst.msk [vmem:[#allocation2 + $0x28] sm:$0xff] %vm1710_vm9, %v1699_v31  ;;  %1717 = vst.msk [vmem:[#allocation2 + $0x30] sm:$0xff] %vm1710_vm9, %v1700_v56  ;;  %v1685_v55 = vadd.f32 %v6391_v4, %v1664_v60  ;;  %v1686_v11 = vadd.f32 %v6391_v4, %v1665_v61  ;;  %v1747_v16 = vmax.f32 %v1728_v8, %v1738_v53  ;;  %v1753_v28 = vld [vmem:[#allocation2 + $0x2] ss:$3 sm:$0xff] }
 0x16d   : > { %v1645_v49 = vsel %vm1640_vm8, %v1634_v20, %v1635_v7  ;;  %v1646_v18 = vsel %vm1640_vm8, %v1633_v26, %v1634_v20  ;;  %v4806_v19 = vpop.f32.mrb[60].mxu0  ;;  %v5284_v26 = vpack.c.bf16 %v4097_v6, %v4096_v17  ;;  %v4105_v6 = vld [vmem:[%s7083_s2 + $0xb0] sm:$0xff] }
 0x16e   : > { %v1701_v54 = vmax.f32 %v1685_v55, 0.0  ;;  %v1702_v21 = vmax.f32 %v1686_v11, 0.0  ;;  %v1666_v22 = vadd.f32 %v1646_v18, %v6353_v29  ;;  %v1667_v14 = vadd.f32 %v1645_v49, %v6355_v33  ;;  %v1605_v24 = vpop.f32.mrb[61].mxu0  ;;  %v1770_v33 = vld [vmem:[%s7083_s2 + $0x18] sm:$0xff] }
 0x16f   : > { %v1637_v1 = vrot.slane %v4806_v19, 6  ;;  %v1636_v3 = vrot.slane %v1605_v24, 6  ;;  %v6452_v36 = vmax.f32 %v1747_v16, %v1753_v28  ;;  %v5266_v51 = vpack.c.bf16 %v1770_v33, %v1769_v34  ;;  %v4087_v24 = vld [vmem:[%s7083_s2 + $0x70] sm:$0xff]  ;;  %v4088_v28 = vld [vmem:[%s7083_s2 + $0x78] sm:$0xff]  ;;  %v4104_v33 = vld [vmem:[%s7083_s2 + $0xa8] sm:$0xff] }
 0x170   : > { %1718 = vst.msk [vmem:[#allocation2 + $0x38] sm:$0xff] %vm1710_vm9, %v1701_v54  ;;  %1719 = vst.msk [vmem:[#allocation2 + $0x40] sm:$0xff] %vm1710_vm9, %v1702_v21  ;;  %v1687_v25 = vadd.f32 %v6391_v4, %v1666_v22  ;;  %v1688_v29 = vadd.f32 %v6391_v4, %v1667_v14  ;;  %v4086_v54 = vld [vmem:[%s7083_s2 + $0x68] sm:$0xff]  ;;  %v4112_v21 = vld [vmem:[%s7083_s2 + $0xc0] sm:$0xff] }
 0x171   : > { %v1643_v41 = vsel %vm1640_vm8, %v1636_v3, %v1637_v1  ;;  %v1644_v42 = vsel %vm1640_vm8, %v1635_v7, %v1636_v3  ;;  %4819 = vmatmul.mubr.msk.f32.vlgmr.msra.gmra.mrb[48].mxu1 %vm1710_vm9, %v6452_v36  ;;  %4865 = vmatmul.mubr.msk.f32.vlgmr.msra.gmra.mrb[64].mxu0 %vm1710_vm9, %v6452_v36  ;;  %v4809_v9 = vpop.f32.mrb[62].mxu0  ;;  %v4113_v22 = vld [vmem:[%s7083_s2 + $0xc8] sm:$0xff]  ;;  %v4114_v3 = vld [vmem:[%s7083_s2 + $0xd0] sm:$0xff]  ;;  %v4115_v34 = vld [vmem:[%s7083_s2 + $0xd8] sm:$0xff] }
 0x172   : > { %v1703_v10 = vmax.f32 %v1687_v25, 0.0  ;;  %v1704_v44 = vmax.f32 %v1688_v29, 0.0  ;;  %v1668_v45 = vadd.f32 %v1644_v42, %v6368_v15  ;;  %v1669_v46 = vadd.f32 %v1643_v41, %v6370_v50  ;;  %v1615_v37 = vpop.f32.mrb[63].mxu0  ;;  %4821 = vmatprep.mubr.msk.f32.mxu1 %vm5511_vm2, %v5512_v57  ;;  %4867 = vmatprep.mubr.msk.f32.mxu0 %vm5511_vm2, %v5512_v57  ;;  %v4103_v29 = vld [vmem:[%s7083_s2 + $0xa0] sm:$0xff]  ;;  %v4106_v41 = vld [vmem:[%s7083_s2 + $0xb8] sm:$0xff] }
 0x173   : > { %v1639_v40 = vrot.slane %v4809_v9, 6  ;;  %v1638_v39 = vrot.slane %v1615_v37, 6  ;;  %v1730_v43 = vld [vmem:[#allocation2 + $0x18] ss:$3 sm:$0xff]  ;;  %v1740_v13 = vld [vmem:[#allocation2 + $0x19] ss:$3 sm:$0xff]  ;;  %5264 = vmatpush3.bf16.msra.mxu1 %v5263_v52  ;;  %5282 = vmatpush3.bf16.msra.mxu0 %v5281_v5  ;;  %v5278_v5 = vpack.c.bf16 %v4088_v28, %v4087_v24  ;;  %v5296_v25 = vpack.c.bf16 %v4115_v34, %v4114_v3 }
 0x174   : > { %1720 = vst.msk [vmem:[#allocation2 + $0x48] sm:$0xff] %vm1710_vm9, %v1703_v10  ;;  %1721 = vst.msk [vmem:[#allocation2 + $0x50] sm:$0xff] %vm1710_vm9, %v1704_v44  ;;  %v1689_v15 = vadd.f32 %v6391_v4, %v1668_v45  ;;  %v1690_v50 = vadd.f32 %v6391_v4, %v1669_v46  ;;  %v1748_v27 = vmax.f32 %v1730_v43, %v1740_v13  ;;  %5265 = vmatprep.subr.bf16.mxu1 %v5510_v35  ;;  %v1755_v31 = vld [vmem:[#allocation2 + $0x1a] ss:$3 sm:$0xff]  ;;  %v4128_v10 = vld [vmem:[%s7083_s2 + $0x110] sm:$0xff] }
 0x175   : > { %5283 = vmatprep.subr.bf16.mxu0 %v5510_v35  ;;  %v1641_v47 = vsel %vm1640_vm8, %v1638_v39, %v1639_v40  ;;  %v1642_v59 = vsel %vm1640_vm8, %v1637_v1, %v1638_v39  ;;  %v4085_v52 = vld [vmem:[%s7083_s2 + $0x60] sm:$0xff]  ;;  %v5293_v1 = vpack.c.bf16 %v4113_v22, %v4112_v21  ;;  %v5287_v17 = vpack.c.bf16 %v4104_v33, %v4103_v29  ;;  %v4127_v9 = vld [vmem:[%s7083_s2 + $0x108] sm:$0xff]  ;;  %v4129_v45 = vld [vmem:[%s7083_s2 + $0x118] sm:$0xff] }
 0x176   : > { %v1705_v12 = vmax.f32 %v1689_v15, 0.0  ;;  %v1706_v30 = vmax.f32 %v1690_v50, 0.0  ;;  %v1670_v32 = vadd.f32 %v1642_v59, %v6382_v2  ;;  %v1671_v56 = vadd.f32 %v1641_v47, %v6384_v38  ;;  %v4122_v37 = vld [vmem:[%s7083_s2 + $0xe0] sm:$0xff]  ;;  %v4123_v40 = vld [vmem:[%s7083_s2 + $0xe8] sm:$0xff]  ;;  %v4147_v15 = vld [vmem:[%s7083_s2 + $0x170] sm:$0xff] }
 0x177   : > { %v6496_v60 = vmax.f32 %v1748_v27, %v1755_v31  ;;  %v1732_v61 = vld [vmem:[#allocation2 + $0x30] ss:$3 sm:$0xff]  ;;  %v1742_v62 = vld [vmem:[#allocation2 + $0x31] ss:$3 sm:$0xff]  ;;  %5267 = vmatpush3.bf16.msra.mxu1 %v5266_v51  ;;  %5285 = vmatpush3.bf16.msra.mxu0 %v5284_v26  ;;  %v1757_v38 = vld [vmem:[#allocation2 + $0x32] ss:$3 sm:$0xff]  ;;  %v5275_v14 = vpack.c.bf16 %v4086_v54, %v4085_v52  ;;  %v5290_v42 = vpack.c.bf16 %v4106_v41, %v4105_v6 }
 0x178   : > { %1722 = vst.msk [vmem:[#allocation2 + $0x58] sm:$0xff] %vm1710_vm9, %v1705_v12  ;;  %1723 = vst.msk [vmem:[#allocation2 + $0x60] sm:$0xff] %vm1710_vm9, %v1706_v30  ;;  %v1691_v63 = vadd.f32 %v6391_v4, %v1670_v32  ;;  %v1749_v0 = vmax.f32 %v1732_v61, %v1742_v62  ;;  %5274 = vmatprep.subr.bf16.mxu1 %v5510_v35  ;;  %5292 = vmatprep.subr.bf16.mxu0 %v5510_v35  ;;  %v4145_v51 = vld [vmem:[%s7083_s2 + $0x160] sm:$0xff]  ;;  %v4146_v26 = vld [vmem:[%s7083_s2 + $0x168] sm:$0xff] }
 0x179   : > { %v1692_v2 = vadd.f32 %v6391_v4, %v1671_v56  ;;  %4822 = vmatmul.mubr.msk.f32.gmra.mrb[50].mxu1 %vm1710_vm9, %v6496_v60  ;;  %4868 = vmatmul.mubr.msk.f32.gmra.mrb[66].mxu0 %vm1710_vm9, %v6496_v60  ;;  %v5302_v46 = vpack.c.bf16 %v4129_v45, %v4128_v10  ;;  %v6701_v39 = vpack.c.bf16 %v4123_v40, %v4122_v37  ;;  %v4148_v59 = vld [vmem:[%s7083_s2 + $0x178] sm:$0xff] }
 0x17a   : > { %v1707_v7 = vmax.f32 %v1691_v63, 0.0  ;;  %4824 = vmatprep.mubr.msk.f32.mxu1 %vm5511_vm2, %v5512_v57  ;;  %4870 = vmatprep.mubr.msk.f32.mxu0 %vm5511_vm2, %v5512_v57  ;;  %v6512_v20 = vmax.f32 %v1749_v0, %v1757_v38  ;;  %v5323_v47 = vpack.c.bf16 %v4146_v26, %v4145_v51  ;;  %v5326_v12 = vpack.c.bf16 %v4148_v59, %v4147_v15 }
 0x17b   : > { %v1708_v8 = vmax.f32 %v1692_v2, 0.0 }
 0x17c   : > { %1724 = vst.msk [vmem:[#allocation2 + $0x68] sm:$0xff] %vm1710_vm9, %v1707_v7 }
 0x17d   : > { %1725 = vst.msk [vmem:[#allocation2 + $0x70] sm:$0xff] %vm1710_vm9, %v1708_v8  ;;  %4825 = vmatmul.mubr.msk.f32.gmra.mrb[52].mxu1 %vm1710_vm9, %v6512_v20  ;;  %4871 = vmatmul.mubr.msk.f32.gmra.mrb[68].mxu0 %vm1710_vm9, %v6512_v20 }
 0x17e   : > { %4827 = vmatprep.mubr.msk.f32.mxu1 %vm5511_vm2, %v5512_v57  ;;  %4873 = vmatprep.mubr.msk.f32.mxu0 %vm5511_vm2, %v5512_v57 }
 0x17f   : > { %v1734_v4 = vld [vmem:[#allocation2 + $0x48] ss:$3 sm:$0xff]  ;;  %v1744_v53 = vld [vmem:[#allocation2 + $0x49] ss:$3 sm:$0xff]  ;;  %v1759_v11 = vld [vmem:[#allocation2 + $0x4a] ss:$3 sm:$0xff] }
 0x180   : > { %v1750_v55 = vmax.f32 %v1734_v4, %v1744_v53 }
 0x182   : > { %v6524_v16 = vmax.f32 %v1750_v55, %v1759_v11 }
 0x184   : > { %4828 = vmatmul.mubr.msk.f32.gmra.mrb[54].mxu1 %vm1710_vm9, %v6524_v16  ;;  %4874 = vmatmul.mubr.msk.f32.gmra.mrb[70].mxu0 %vm1710_vm9, %v6524_v16  ;;  %v1736_v23 = vld [vmem:[#allocation2 + $0x60] ss:$3 sm:$0xff]  ;;  %v1746_v48 = vld [vmem:[#allocation2 + $0x61] ss:$3 sm:$0xff]  ;;  %v1761_v18 = vld [vmem:[#allocation2 + $0x62] ss:$3 sm:$0xff] }
 0x185   : > { %4830 = vmatprep.mubr.msk.f32.mxu1 %vm5511_vm2, %v5512_v57  ;;  %4876 = vmatprep.mubr.msk.f32.mxu0 %vm5511_vm2, %v5512_v57  ;;  %v1751_v49 = vmax.f32 %v1736_v23, %v1746_v48 }
 0x187   : > { %v6534_v19 = vmax.f32 %v1751_v49, %v1761_v18 }
 0x189   : > { %4831 = vmatmul.mubr.msk.f32.gmra.mrb[56].mxu1 %vm1710_vm9, %v6534_v19  ;;  %4877 = vmatmul.mubr.msk.f32.gmra.mrb[72].mxu0 %vm1710_vm9, %v6534_v19 }
 0x18a   : > { %4841 = vmatprep.mubr.msk.f32.mxu1 %vm5511_vm2, %v5512_v57  ;;  %4910 = vmatprep.mubr.msk.f32.mxu0 %vm5511_vm2, %v5512_v57 }
 0x18d   : > { %4842 = vmatmul.mubr.msk.f32.vlgmr.msra.gmra.mrb[58].mxu1 %vm1710_vm9, %v6452_v36  ;;  %4911 = vmatmul.mubr.msk.f32.vlgmr.msra.gmra.mrb[74].mxu0 %vm1710_vm9, %v6452_v36 }
 0x18e   : > { %5276 = vmatpush3.bf16.msra.mxu1 %v5275_v14  ;;  %4844 = vmatprep.mubr.msk.f32.mxu1 %vm5511_vm2, %v5512_v57 }
 0x18f   : > { %4913 = vmatprep.mubr.msk.f32.mxu0 %vm5511_vm2, %v5512_v57  ;;  %5277 = vmatprep.subr.bf16.mxu1 %v5510_v35 }
 0x190   : > { %5294 = vmatpush3.bf16.msra.mxu0 %v5293_v1 }
 0x191   : > { %4845 = vmatmul.mubr.msk.f32.gmra.mrb[60].mxu1 %vm1710_vm9, %v6496_v60  ;;  %4914 = vmatmul.mubr.msk.f32.gmra.mrb[76].mxu0 %vm1710_vm9, %v6496_v60 }
 0x192   : > { %4847 = vmatprep.mubr.msk.f32.mxu1 %vm5511_vm2, %v5512_v57  ;;  %4916 = vmatprep.mubr.msk.f32.mxu0 %vm5511_vm2, %v5512_v57 }
 0x193   : > { %5279 = vmatpush3.bf16.msra.mxu1 %v5278_v5  ;;  %5295 = vmatprep.subr.bf16.mxu0 %v5510_v35 }
 0x194   : > { %5297 = vmatpush3.bf16.msra.mxu0 %v5296_v25  ;;  %5286 = vmatprep.subr.bf16.mxu1 %v5510_v35 }
 0x195   : > { %4848 = vmatmul.mubr.msk.f32.gmra.mrb[62].mxu1 %vm1710_vm9, %v6512_v20  ;;  %4917 = vmatmul.mubr.msk.f32.gmra.mrb[78].mxu0 %vm1710_vm9, %v6512_v20 }
 0x196   : > { %4850 = vmatprep.mubr.msk.f32.mxu1 %vm5511_vm2, %v5512_v57  ;;  %4919 = vmatprep.mubr.msk.f32.mxu0 %vm5511_vm2, %v5512_v57 }
 0x197   : > { %5322 = vmatprep.subr.bf16.mxu0 %v5510_v35 }
 0x199   : > { %4851 = vmatmul.mubr.msk.f32.gmra.mrb[64].mxu1 %vm1710_vm9, %v6524_v16  ;;  %4920 = vmatmul.mubr.msk.f32.gmra.mrb[80].mxu0 %vm1710_vm9, %v6524_v16 }
 0x19a   : > { %4853 = vmatprep.mubr.msk.f32.mxu1 %vm5511_vm2, %v5512_v57  ;;  %4922 = vmatprep.mubr.msk.f32.mxu0 %vm5511_vm2, %v5512_v57 }
 0x19d   : > { %4854 = vmatmul.mubr.msk.f32.gmra.mrb[66].mxu1 %vm1710_vm9, %v6534_v19  ;;  %4923 = vmatmul.mubr.msk.f32.gmra.mrb[82].mxu0 %vm1710_vm9, %v6534_v19 }
 0x19e   : > { %4887 = vmatprep.mubr.msk.f32.mxu1 %vm5511_vm2, %v5512_v57  ;;  %4956 = vmatprep.mubr.msk.f32.mxu0 %vm5511_vm2, %v5512_v57 }
 0x1a1   : > { %4888 = vmatmul.mubr.msk.f32.vlgmr.msra.gmra.mrb[68].mxu1 %vm1710_vm9, %v6452_v36  ;;  %4957 = vmatmul.mubr.msk.f32.vlgmr.msra.gmra.mrb[84].mxu0 %vm1710_vm9, %v6452_v36 }
 0x1a2   : > { %5288 = vmatpush3.bf16.msra.mxu1 %v5287_v17  ;;  %4890 = vmatprep.mubr.msk.f32.mxu1 %vm5511_vm2, %v5512_v57 }
 0x1a3   : > { %4959 = vmatprep.mubr.msk.f32.mxu0 %vm5511_vm2, %v5512_v57  ;;  %5289 = vmatprep.subr.bf16.mxu1 %v5510_v35 }
 0x1a4   : > { %5324 = vmatpush3.bf16.msra.mxu0 %v5323_v47 }
 0x1a5   : > { %4891 = vmatmul.mubr.msk.f32.gmra.mrb[70].mxu1 %vm1710_vm9, %v6496_v60  ;;  %4960 = vmatmul.mubr.msk.f32.gmra.mrb[86].mxu0 %vm1710_vm9, %v6496_v60 }
 0x1a6   : > { %4893 = vmatprep.mubr.msk.f32.mxu1 %vm5511_vm2, %v5512_v57  ;;  %4962 = vmatprep.mubr.msk.f32.mxu0 %vm5511_vm2, %v5512_v57 }
 0x1a7   : > { %5291 = vmatpush3.bf16.msra.mxu1 %v5290_v42  ;;  %5325 = vmatprep.subr.bf16.mxu0 %v5510_v35 }
 0x1a8   : > { %5327 = vmatpush3.bf16.msra.mxu0 %v5326_v12 }
 0x1a9   : > { %4894 = vmatmul.mubr.msk.f32.gmra.mrb[72].mxu1 %vm1710_vm9, %v6512_v20  ;;  %4963 = vmatmul.mubr.msk.f32.gmra.mrb[88].mxu0 %vm1710_vm9, %v6512_v20 }
 0x1aa   : > { %4896 = vmatprep.mubr.msk.f32.mxu1 %vm5511_vm2, %v5512_v57  ;;  %4965 = vmatprep.mubr.msk.f32.mxu0 %vm5511_vm2, %v5512_v57 }
 0x1ab   : > { %5328 = vmatprep.subr.bf16.mxu0 %v5510_v35 }
 0x1ad   : > { %4897 = vmatmul.mubr.msk.f32.gmra.mrb[74].mxu1 %vm1710_vm9, %v6524_v16  ;;  %4966 = vmatmul.mubr.msk.f32.gmra.mrb[90].mxu0 %vm1710_vm9, %v6524_v16 }
 0x1ae   : > { %4899 = vmatprep.mubr.msk.f32.mxu1 %vm5511_vm2, %v5512_v57  ;;  %4968 = vmatprep.mubr.msk.f32.mxu0 %vm5511_vm2, %v5512_v57 }
 0x1b1   : > { %4900 = vmatmul.mubr.msk.f32.gmra.mrb[76].mxu1 %vm1710_vm9, %v6534_v19  ;;  %4969 = vmatmul.mubr.msk.f32.gmra.mrb[92].mxu0 %vm1710_vm9, %v6534_v19 }
 0x1b2   : > { %4933 = vmatprep.mubr.msk.f32.mxu1 %vm5511_vm2, %v5512_v57  ;;  %5012 = vmatprep.mubr.msk.f32.mxu0 %vm5511_vm2, %v5512_v57 }
 0x1b5   : > { %4934 = vmatmul.mubr.msk.f32.vlgmr.msra.gmra.mrb[78].mxu1 %vm1710_vm9, %v6452_v36  ;;  %v4126_v36 = vld [vmem:[%s7083_s2 + $0x100] sm:$0xff] }
 0x1b6   : > { %4936 = vmatprep.mubr.msk.f32.mxu1 %vm5511_vm2, %v5512_v57  ;;  %v5298_v44 = vpack.c.bf16 %v4127_v9, %v4126_v36 }
 0x1b8   : > { %5299 = vmatprep.subr.bf16.mxu1 %v5298_v44 }
 0x1b9   : > { %4937 = vmatmul.mubr.msk.f32.gmra.mrb[80].mxu1 %vm1710_vm9, %v6496_v60 }
 0x1ba   : > { %4939 = vmatprep.mubr.msk.f32.mxu1 %vm5511_vm2, %v5512_v57  ;;  %5301 = vmatpush3.bf16.msra.mxu1 %v5298_v44 }
 0x1bb   : > { %5303 = vmatprep.subr.bf16.mxu1 %v5302_v46 }
 0x1bd   : > { %4940 = vmatmul.mubr.msk.f32.gmra.mrb[82].mxu1 %vm1710_vm9, %v6512_v20 }
 0x1be   : > { %4942 = vmatprep.mubr.msk.f32.mxu1 %vm5511_vm2, %v5512_v57  ;;  %5305 = vmatpush3.bf16.msra.mxu1 %v5302_v46 }
 0x1bf   : > { %5307 = vmatprep.subr.bf16.mxu1 %v6701_v39 }
 0x1c1   : > { %4943 = vmatmul.mubr.msk.f32.gmra.mrb[84].mxu1 %vm1710_vm9, %v6524_v16 }
 0x1c2   : > { %4945 = vmatprep.mubr.msk.f32.mxu1 %vm5511_vm2, %v5512_v57 }
 0x1c5   : > { %4946 = vmatmul.mubr.msk.f32.gmra.mrb[86].mxu1 %vm1710_vm9, %v6534_v19 }
 0x244   : > { %v1857_v43 = vpop.f32.mrb[48].mxu1  ;;  %v2052_v13 = vpop.f32.mrb[64].mxu0 }
 0x245   : > { %v4820_v50 = vpop.f32.mrb[49].mxu1  ;;  %v4866_v27 = vpop.f32.mrb[65].mxu0  ;;  %v1881_v31 = vrot.slane %v1857_v43, 1  ;;  %v2076_v56 = vrot.slane %v2052_v13, 2 }
 0x24c   : > { %v1862_v30 = vpop.f32.mrb[50].mxu1  ;;  %v2057_v32 = vpop.f32.mrb[66].mxu0 }
 0x24d   : > { %v1882_v60 = vrot.slane %v1862_v30, 1  ;;  %v2077_v61 = vrot.slane %v2057_v32, 2  ;;  %v4823_v62 = vpop.f32.mrb[51].mxu1  ;;  %v4869_v63 = vpop.f32.mrb[67].mxu0 }
 0x24f   : > { %v1889_v0 = vsel %vm473_vm3, %v1881_v31, %v1882_v60  ;;  %v2084_v2 = vsel %vm812_vm4, %v2076_v56, %v2077_v61 }
 0x250   : > { %v1867_v38 = vpop.f32.mrb[52].mxu1  ;;  %v2062_v7 = vpop.f32.mrb[68].mxu0 }
 0x251   : > { %v1883_v20 = vrot.slane %v1867_v38, 1  ;;  %v2078_v8 = vrot.slane %v2062_v7, 2  ;;  %v4826_v4 = vpop.f32.mrb[53].mxu1  ;;  %v4872_v53 = vpop.f32.mrb[69].mxu0 }
 0x253   : > { %v1888_v55 = vsel %vm473_vm3, %v1882_v60, %v1883_v20  ;;  %v2083_v11 = vsel %vm812_vm4, %v2077_v61, %v2078_v8 }
 0x257   : > { %v1872_v16 = vpop.f32.mrb[54].mxu1  ;;  %v2067_v23 = vpop.f32.mrb[70].mxu0 }
 0x258   : > { %v1884_v48 = vrot.slane %v1872_v16, 1  ;;  %v2079_v49 = vrot.slane %v2067_v23, 2  ;;  %v4829_v18 = vpop.f32.mrb[55].mxu1  ;;  %v4875_v19 = vpop.f32.mrb[71].mxu0 }
 0x25a   : > { %v1887_v52 = vsel %vm473_vm3, %v1883_v20, %v1884_v48  ;;  %v2082_v54 = vsel %vm812_vm4, %v2078_v8, %v2079_v49 }
 0x25c   : > { %v1877_v21 = vpop.f32.mrb[56].mxu1  ;;  %v2072_v22 = vpop.f32.mrb[72].mxu0 }
 0x25d   : > { %v1885_v14 = vrot.slane %v1877_v21, 1  ;;  %v2080_v24 = vrot.slane %v2072_v22, 2  ;;  %v4832_v28 = vpop.f32.mrb[57].mxu1  ;;  %v4878_v1 = vpop.f32.mrb[73].mxu0 }
 0x25f   : > { %v1886_v3 = vsel %vm473_vm3, %v1884_v48, %v1885_v14  ;;  %v2081_v34 = vsel %vm812_vm4, %v2079_v49, %v2080_v24  ;;  %v1890_v5 = vsel %vm473_vm3, %v1885_v14, %v1881_v31  ;;  %v2085_v25 = vsel %vm812_vm4, %v2080_v24, %v2076_v56 }
 0x260   : > { %v1957_v29 = vpop.f32.mrb[58].mxu1  ;;  %v2272_v33 = vpop.f32.mrb[74].mxu0 }
 0x261   : > { %v1958_v17 = vadd.f32 %v1957_v29, %v1889_v0  ;;  %v4843_v6 = vpop.f32.mrb[59].mxu1  ;;  %v4912_v41 = vpop.f32.mrb[75].mxu0  ;;  %v2296_v10 = vrot.slane %v2272_v33, 4 }
 0x263   : > { %v2086_v42 = vadd.f32 %v2084_v2, %v1958_v17 }
 0x264   : > { %v1962_v36 = vpop.f32.mrb[60].mxu1  ;;  %v2277_v9 = vpop.f32.mrb[76].mxu0 }
 0x265   : > { %v1963_v44 = vadd.f32 %v1962_v36, %v1888_v55  ;;  %v2297_v45 = vrot.slane %v2277_v9, 4  ;;  %v4846_v46 = vpop.f32.mrb[61].mxu1  ;;  %v4915_v37 = vpop.f32.mrb[77].mxu0 }
 0x267   : > { %v2087_v40 = vadd.f32 %v2083_v11, %v1963_v44  ;;  %v2304_v43 = vsel %vm1226_vm6, %v2296_v10, %v2297_v45 }
 0x268   : > { %v1967_v13 = vpop.f32.mrb[62].mxu1  ;;  %v2282_v51 = vpop.f32.mrb[78].mxu0 }
 0x269   : > { %v1968_v26 = vadd.f32 %v1967_v13, %v1887_v52  ;;  %v2298_v15 = vrot.slane %v2282_v51, 4  ;;  %v4849_v50 = vpop.f32.mrb[63].mxu1  ;;  %v4918_v27 = vpop.f32.mrb[79].mxu0 }
 0x26b   : > { %v2088_v47 = vadd.f32 %v2082_v54, %v1968_v26  ;;  %v2303_v59 = vsel %vm1226_vm6, %v2297_v45, %v2298_v15 }
 0x26c   : > { %v1972_v12 = vpop.f32.mrb[64].mxu1  ;;  %v2287_v30 = vpop.f32.mrb[80].mxu0 }
 0x26d   : > { %v1973_v32 = vadd.f32 %v1972_v12, %v1886_v3  ;;  %v2299_v31 = vrot.slane %v2287_v30, 4  ;;  %v4852_v56 = vpop.f32.mrb[65].mxu1  ;;  %v4921_v60 = vpop.f32.mrb[81].mxu0 }
 0x26f   : > { %v2089_v61 = vadd.f32 %v2081_v34, %v1973_v32  ;;  %v2302_v62 = vsel %vm1226_vm6, %v2298_v15, %v2299_v31 }
 0x270   : > { %v1977_v63 = vpop.f32.mrb[66].mxu1  ;;  %v2292_v0 = vpop.f32.mrb[82].mxu0 }
 0x271   : > { %v1978_v2 = vadd.f32 %v1977_v63, %v1890_v5  ;;  %v2300_v38 = vrot.slane %v2292_v0, 4  ;;  %v4855_v7 = vpop.f32.mrb[67].mxu1  ;;  %v4924_v20 = vpop.f32.mrb[83].mxu0 }
 0x273   : > { %v2090_v8 = vadd.f32 %v2085_v25, %v1978_v2  ;;  %v2301_v4 = vsel %vm1226_vm6, %v2299_v31, %v2300_v38  ;;  %v2305_v53 = vsel %vm1226_vm6, %v2300_v38, %v2296_v10 }
 0x274   : > { %v2162_v55 = vpop.f32.mrb[68].mxu1  ;;  %v2492_v11 = vpop.f32.mrb[84].mxu0 }
 0x275   : > { %v4889_v16 = vpop.f32.mrb[69].mxu1  ;;  %v4958_v23 = vpop.f32.mrb[85].mxu0  ;;  %v2186_v18 = vrot.slane %v2162_v55, 3  ;;  %v2516_v19 = vrot.slane %v2492_v11, 6 }
 0x276   : > { %v4121_v23 = vld [vmem:[%s7085_s4 + $0x1] ss:$0 sm:$0xff] }
 0x278   : > { %v2167_v48 = vpop.f32.mrb[70].mxu1  ;;  %v2497_v49 = vpop.f32.mrb[86].mxu0 }
 0x279   : > { %v2187_v52 = vrot.slane %v2167_v48, 3  ;;  %v2517_v54 = vrot.slane %v2497_v49, 6  ;;  %v4892_v21 = vpop.f32.mrb[71].mxu1  ;;  %v4961_v22 = vpop.f32.mrb[87].mxu0 }
 0x27b   : > { %v2194_v14 = vsel %vm1019_vm5, %v2186_v18, %v2187_v52  ;;  %v2524_v24 = vsel %vm1640_vm8, %v2516_v19, %v2517_v54 }
 0x27c   : > { %v2196_v28 = vadd.f32 %v2194_v14, %v2086_v42  ;;  %v2172_v1 = vpop.f32.mrb[72].mxu1  ;;  %v2502_v3 = vpop.f32.mrb[88].mxu0 }
 0x27d   : > { %v2188_v34 = vrot.slane %v2172_v1, 3  ;;  %v2518_v5 = vrot.slane %v2502_v3, 6  ;;  %v4895_v25 = vpop.f32.mrb[73].mxu1  ;;  %v4964_v29 = vpop.f32.mrb[89].mxu0 }
 0x27e   : > { %v2306_v33 = vadd.f32 %v2304_v43, %v2196_v28 }
 0x27f   : > { %v2193_v17 = vsel %vm1019_vm5, %v2187_v52, %v2188_v34  ;;  %v2523_v6 = vsel %vm1640_vm8, %v2517_v54, %v2518_v5 }
 0x280   : > { %v2197_v41 = vadd.f32 %v2193_v17, %v2087_v40  ;;  %v2177_v36 = vpop.f32.mrb[74].mxu1  ;;  %v2507_v9 = vpop.f32.mrb[90].mxu0 }
 0x281   : > { %v2189_v10 = vrot.slane %v2177_v36, 3  ;;  %v2519_v44 = vrot.slane %v2507_v9, 6  ;;  %v4898_v45 = vpop.f32.mrb[75].mxu1  ;;  %v4967_v42 = vpop.f32.mrb[91].mxu0 }
 0x282   : > { %v2307_v46 = vadd.f32 %v2303_v59, %v2197_v41 }
 0x283   : > { %v2192_v37 = vsel %vm1019_vm5, %v2188_v34, %v2189_v10  ;;  %v2522_v43 = vsel %vm1640_vm8, %v2518_v5, %v2519_v44 }
 0x284   : > { %v2198_v13 = vadd.f32 %v2192_v37, %v2088_v47  ;;  %v2182_v51 = vpop.f32.mrb[76].mxu1  ;;  %v2512_v26 = vpop.f32.mrb[92].mxu0 }
 0x285   : > { %v2190_v15 = vrot.slane %v2182_v51, 3  ;;  %v2520_v50 = vrot.slane %v2512_v26, 6  ;;  %v4901_v27 = vpop.f32.mrb[77].mxu1  ;;  %v4970_v40 = vpop.f32.mrb[93].mxu0 }
 0x286   : > { %v2308_v12 = vadd.f32 %v2302_v62, %v2198_v13  ;;  %v4124_v40 = vld [vmem:[%s7083_s2 + $0xf0] sm:$0xff] }
 0x287   : > { %v2191_v30 = vsel %vm1019_vm5, %v2189_v10, %v2190_v15  ;;  %v2195_v59 = vsel %vm1019_vm5, %v2190_v15, %v2186_v18  ;;  %v2521_v32 = vsel %vm1640_vm8, %v2519_v44, %v2520_v50  ;;  %v2525_v31 = vsel %vm1640_vm8, %v2520_v50, %v2516_v19 }
 0x288   : > { %v2199_v47 = vadd.f32 %v2191_v30, %v2089_v61  ;;  %v2200_v56 = vadd.f32 %v2195_v59, %v2090_v8  ;;  %v2382_v60 = vpop.f32.mrb[78].mxu1 }
 0x289   : > { %v4935_v63 = vpop.f32.mrb[79].mxu1  ;;  %v2406_v62 = vrot.slane %v2382_v60, 5 }
 0x28a   : > { %v2309_v0 = vadd.f32 %v2301_v4, %v2199_v47  ;;  %v2310_v2 = vadd.f32 %v2305_v53, %v2200_v56  ;;  %v4134_v47 = vld [vmem:[%s7083_s2 + $0x120] sm:$0xff]  ;;  %v4135_v56 = vld [vmem:[%s7083_s2 + $0x128] sm:$0xff]  ;;  %v4136_v63 = vld [vmem:[%s7083_s2 + $0x130] sm:$0xff] }
 0x28b   : > { %v5314_v60 = vpack.c.bf16 %v4135_v56, %v4134_v47  ;;  %v4173_v56 = vld [vmem:[%s7083_s2 + $0x200] sm:$0xff] }
 0x28c   : > { %v2387_v38 = vpop.f32.mrb[80].mxu1 }
 0x28d   : > { %v2407_v7 = vrot.slane %v2387_v38, 5  ;;  %v4938_v20 = vpop.f32.mrb[81].mxu1 }
 0x28e   : > { %v4152_v20 = vld [vmem:[%s7083_s2 + $0x188] sm:$0xff] }
 0x28f   : > { %v2414_v55 = vsel %vm1433_vm7, %v2406_v62, %v2407_v7 }
 0x290   : > { %v2416_v11 = vadd.f32 %v2414_v55, %v2306_v33  ;;  %v2392_v16 = vpop.f32.mrb[82].mxu1 }
 0x291   : > { %v2408_v48 = vrot.slane %v2392_v16, 5  ;;  %v4941_v61 = vpop.f32.mrb[83].mxu1  ;;  %v4154_v16 = vld [vmem:[%s7083_s2 + $0x198] sm:$0xff] }
 0x292   : > { %v2526_v8 = vadd.f32 %v2524_v24, %v2416_v11  ;;  %v4153_v11 = vld [vmem:[%s7083_s2 + $0x190] sm:$0xff] }
 0x293   : > { %v2413_v4 = vsel %vm1433_vm7, %v2407_v7, %v2408_v48  ;;  %v4151_v7 = vld [vmem:[%s7083_s2 + $0x180] sm:$0xff] }
 0x294   : > { %v2536_v53 = vadd.f32 %v4121_v23, %v2526_v8  ;;  %v2417_v49 = vadd.f32 %v2413_v4, %v2307_v46  ;;  %v2397_v18 = vpop.f32.mrb[84].mxu1  ;;  %v5335_v55 = vpack.c.bf16 %v4152_v20, %v4151_v7  ;;  %v4179_v20 = vld [vmem:[%s7083_s2 + $0x230] sm:$0xff] }
 0x295   : > { %v2409_v19 = vrot.slane %v2397_v18, 5  ;;  %v4944_v52 = vpop.f32.mrb[85].mxu1  ;;  %v4142_v18 = vld [vmem:[%s7083_s2 + $0x148] sm:$0xff] }
 0x296   : > { %v2541_v54 = vmax.f32 %v2536_v53, 0.0  ;;  %v2527_v21 = vadd.f32 %v2523_v6, %v2417_v49  ;;  %v4141_v49 = vld [vmem:[%s7083_s2 + $0x140] sm:$0xff] }
 0x297   : > { %v2412_v22 = vsel %vm1433_vm7, %v2408_v48, %v2409_v19  ;;  %v4140_v48 = vld [vmem:[%s7085_s4 + $0x2] ss:$0 sm:$0xff] }
 0x298   : > { %2546 = vst.msk [vmem:[#allocation2] sm:$0xff] %vm1710_vm9, %v2541_v54  ;;  %v2537_v14 = vadd.f32 %v4121_v23, %v2527_v21  ;;  %v2418_v28 = vadd.f32 %v2412_v22, %v2308_v12  ;;  %v2402_v1 = vpop.f32.mrb[86].mxu1  ;;  %v4125_v12 = vld [vmem:[%s7083_s2 + $0xf8] sm:$0xff]  ;;  %v5329_v21 = vpack.c.bf16 %v4142_v18, %v4141_v49 }
 0x299   : > { %v2410_v3 = vrot.slane %v2402_v1, 5  ;;  %v4947_v24 = vpop.f32.mrb[87].mxu1  ;;  %v4144_v1 = vld [vmem:[%s7083_s2 + $0x158] sm:$0xff] }
 0x29a   : > { %v2542_v34 = vmax.f32 %v2537_v14, 0.0  ;;  %v2528_v5 = vadd.f32 %v2522_v43, %v2418_v28  ;;  %v4143_v28 = vld [vmem:[%s7083_s2 + $0x150] sm:$0xff] }
 0x29b   : > { %v2411_v25 = vsel %vm1433_vm7, %v2409_v19, %v2410_v3  ;;  %v2415_v29 = vsel %vm1433_vm7, %v2410_v3, %v2406_v62  ;;  %v5332_v24 = vpack.c.bf16 %v4144_v1, %v4143_v28  ;;  %v4185_v28 = vld [vmem:[%s7083_s2 + $0x250] sm:$0xff]  ;;  %v4186_v1 = vld [vmem:[%s7083_s2 + $0x258] sm:$0xff] }
 0x29c   : > { %2547 = vst.msk [vmem:[#allocation2 + $0x8] sm:$0xff] %vm1710_vm9, %v2542_v34  ;;  %v2538_v33 = vadd.f32 %v4121_v23, %v2528_v5  ;;  %v2419_v17 = vadd.f32 %v2411_v25, %v2309_v0  ;;  %v2420_v6 = vadd.f32 %v2415_v29, %v2310_v2  ;;  %v4137_v0 = vld [vmem:[%s7083_s2 + $0x138] sm:$0xff]  ;;  %v4157_v34 = vld [vmem:[%s7083_s2 + $0x1a0] sm:$0xff]  ;;  %v4158_v5 = vld [vmem:[%s7083_s2 + $0x1a8] sm:$0xff] }
 0x29d   : > { %v5318_v62 = vpack.c.bf16 %v4137_v0, %v4136_v63  ;;  %v5347_v25 = vpack.c.bf16 %v4158_v5, %v4157_v34  ;;  %v4161_v29 = vld [vmem:[%s7083_s2 + $0x1c0] sm:$0xff]  ;;  %v3572_v5 = vld [vmem:[%s7084_s3 + $0x8] sm:$0xff] }
 0x29e   : > { %v2543_v41 = vmax.f32 %v2538_v33, 0.0  ;;  %v2529_v36 = vadd.f32 %v2521_v32, %v2419_v17  ;;  %v2530_v9 = vadd.f32 %v2525_v31, %v2420_v6  ;;  %v5310_v31 = vpack.c.bf16 %v4125_v12, %v4124_v40  ;;  %v4162_v33 = vld [vmem:[%s7083_s2 + $0x1c8] sm:$0xff]  ;;  %v4159_v6 = vld [vmem:[%s7083_s2 + $0x1b0] sm:$0xff]  ;;  %v4177_v0 = vld [vmem:[%s7083_s2 + $0x220] sm:$0xff] }
 0x29f   : > { %v5341_v17 = vpack.c.bf16 %v4162_v33, %v4161_v29  ;;  %v3571_v34 = vld [vmem:[%s7084_s3] sm:$0xff]  ;;  %v3573_v29 = vld [vmem:[%s7084_s3 + $0x10] sm:$0xff]  ;;  %v3574_v33 = vld [vmem:[%s7084_s3 + $0x18] sm:$0xff] }
 0x2a0   : > { %2548 = vst.msk [vmem:[#allocation2 + $0x10] sm:$0xff] %vm1710_vm9, %v2543_v41  ;;  %v2539_v10 = vadd.f32 %v4121_v23, %v2529_v36  ;;  %v2540_v44 = vadd.f32 %v4121_v23, %v2530_v9  ;;  %v5338_v23 = vpack.c.bf16 %v4154_v16, %v4153_v11  ;;  %v4160_v41 = vld [vmem:[%s7083_s2 + $0x1b8] sm:$0xff]  ;;  %v4163_v9 = vld [vmem:[%s7083_s2 + $0x1d0] sm:$0xff] }
 0x2a1   : > { %v5350_v36 = vpack.c.bf16 %v4160_v41, %v4159_v6  ;;  %v3575_v6 = vld [vmem:[%s7084_s3 + $0x20] sm:$0xff]  ;;  %v3576_v41 = vld [vmem:[%s7084_s3 + $0x28] sm:$0xff] }
 0x2a2   : > { %v2544_v45 = vmax.f32 %v2539_v10, 0.0  ;;  %v2545_v42 = vmax.f32 %v2540_v44, 0.0  ;;  %v4164_v10 = vld [vmem:[%s7083_s2 + $0x1d8] sm:$0xff] }
 0x2a3   : > { %v5344_v44 = vpack.c.bf16 %v4164_v10, %v4163_v9  ;;  %v3577_v9 = vld [vmem:[%s7084_s3 + $0x30] sm:$0xff]  ;;  %v3578_v10 = vld [vmem:[%s7084_s3 + $0x38] sm:$0xff] }
 0x2a4   : > { %2549 = vst.msk [vmem:[#allocation2 + $0x18] sm:$0xff] %vm1710_vm9, %v2544_v45 }
 0x2a5   : > { %2550 = vst.msk [vmem:[#allocation2 + $0x20] sm:$0x3] %vm1726_vm10, %v2545_v42 }
 0x2a7   : > { %v2551_v58 = vld [vmem:[#allocation2] ss:$3 sm:$0xff]  ;;  %v2553_v46 = vld [vmem:[#allocation2 + $0x1] ss:$3 sm:$0xff]  ;;  %v2557_v43 = vld [vmem:[#allocation2 + $0x2] ss:$3 sm:$0xff] }
 0x2a8   : > { %v2555_v37 = vmax.f32 %v2551_v58, %v2553_v46 }
 0x2aa   : > { %v2559_v15 = vmax.f32 %v2555_v37, %v2557_v43 }
 0x2ab   : > { %v2552_v13 = vld [vmem:[#allocation2 + $0x18] ss:$3 sm:$0x7]  ;;  %v2554_v51 = vld [vmem:[#allocation2 + $0x19] ss:$3 sm:$0x7] }
 0x2ac   : > { %v2556_v26 = vmax.f32 %v2552_v13, %v2554_v51  ;;  %v2558_v50 = vld [vmem:[#allocation2 + $0x1a] ss:$3 sm:$0x7]  ;;  %v2574_v30 = vrot.slane %v2559_v15, 1  ;;  %v2741_v38 = vrot.slane %v2559_v15, 2 }
 0x2ad   : > { %v4156_v51 = vld [vmem:[%s7085_s4 + $0x3] ss:$0 sm:$0xff] }
 0x2ae   : > { %v2560_v27 = vmax.f32 %v2556_v26, %v2558_v50  ;;  %v4167_v50 = vld [vmem:[%s7083_s2 + $0x1e0] sm:$0xff] }
 0x2b0   : > { %v2575_v59 = vrot.slane %v2560_v27, 1  ;;  %v2742_v2 = vrot.slane %v2560_v27, 2 }
 0x2b2   : > { %v2576_v32 = vsel %vm2573_vm11, %v2574_v30, %v2575_v59 }
 0x2b3   : > { %4979 = vmatprep.mubr.msk.f32.mxu1 %vm1710_vm9, %v2576_v32  ;;  %v4170_v32 = vld [vmem:[%s7083_s2 + $0x1f8] sm:$0xff] }
 0x2b4   : > { %4980 = vmatmul.mubr.msk.f32.vlgmr.msra.gmra.mrb[88].mxu1 %vm1710_vm9, %v2575_v59  ;;  %v4169_v59 = vld [vmem:[%s7083_s2 + $0x1f0] sm:$0xff] }
 0x2b5   : > { %5309 = vmatpush3.bf16.msra.mxu1 %v6701_v39  ;;  %4990 = vmatprep.mubr.msk.f32.mxu1 %vm1710_vm9, %v2559_v15  ;;  %v2743_v39 = vsel %vm2740_vm12, %v2741_v38, %v2742_v2 }
 0x2b6   : > { %5311 = vmatprep.subr.bf16.mxu1 %v5310_v31 }
 0x2b9   : > { %5313 = vmatpush3.bf16.msra.mxu1 %v5310_v31  ;;  %v5356_v31 = vpack.c.bf16 %v4170_v32, %v4169_v59 }
 0x2ba   : > { %5315 = vmatprep.subr.bf16.mxu1 %v5314_v60 }
 0x2bc   : > { %4991 = vmatmul.mubr.msk.f32.vlgmr.msra.gmra.mrb[88].mxu1 %vm1710_vm9, %v2560_v27  ;;  %v4168_v27 = vld [vmem:[%s7083_s2 + $0x1e8] sm:$0xff] }
 0x2bd   : > { %5317 = vmatpush3.bf16.msra.mxu1 %v5314_v60  ;;  %5001 = vmatprep.mubr.msk.f32.mxu1 %vm1710_vm9, %v2743_v39  ;;  %v5353_v12 = vpack.c.bf16 %v4168_v27, %v4167_v50  ;;  %v4174_v60 = vld [vmem:[%s7083_s2 + $0x208] sm:$0xff]  ;;  %v4176_v39 = vld [vmem:[%s7083_s2 + $0x218] sm:$0xff] }
 0x2be   : > { %5319 = vmatprep.subr.bf16.mxu1 %v5318_v62  ;;  %v5365_v63 = vpack.c.bf16 %v4174_v60, %v4173_v56 }
 0x2c1   : > { %5321 = vmatpush3.bf16.msra.mxu1 %v5318_v62  ;;  %v4175_v62 = vld [vmem:[%s7083_s2 + $0x210] sm:$0xff] }
 0x2c2   : > { %5334 = vmatprep.subr.bf16.mxu1 %v5510_v35  ;;  %v5368_v7 = vpack.c.bf16 %v4176_v39, %v4175_v62  ;;  %v3734_v62 = vld [vmem:[%s7084_s3 + $0x60] sm:$0xff]  ;;  %v3735_v39 = vld [vmem:[%s7084_s3 + $0x68] sm:$0xff] }
 0x2c4   : > { %5002 = vmatmul.mubr.msk.f32.vlgmr.msra.gmra.mrb[88].mxu1 %vm1710_vm9, %v2742_v2  ;;  %v4178_v2 = vld [vmem:[%s7083_s2 + $0x228] sm:$0xff] }
 0x2c5   : > { %5034 = vmatprep.mubr.msk.f32.mxu1 %vm5511_vm2, %v5512_v57  ;;  %5336 = vmatpush3.bf16.msra.mxu1 %v5335_v55  ;;  %v5359_v38 = vpack.c.bf16 %v4178_v2, %v4177_v0  ;;  %v4180_v55 = vld [vmem:[%s7083_s2 + $0x238] sm:$0xff] }
 0x2c6   : > { %5337 = vmatprep.subr.bf16.mxu1 %v5510_v35  ;;  %v5362_v11 = vpack.c.bf16 %v4180_v55, %v4179_v20  ;;  %v3658_v0 = vld [vmem:[%s7084_s3 + $0x58] sm:$0xff] }
 0x2c9   : > { %5339 = vmatpush3.bf16.msra.mxu1 %v5338_v23 }
 0x2ca   : > { %5346 = vmatprep.subr.bf16.mxu1 %v5510_v35 }
 0x397   : > { %v5003_v61 = vpop.f32.mrb[88].mxu1 }
 0x398   : > { %v2831_v8 = vadd.f32 %v5003_v61, %v4140_v48  ;;  %v2814_v4 = vpop.f32.mrb[89].mxu1 }
 0x399   : > { %v2830_v53 = vadd.f32 %v4140_v48, %v2814_v4 }
 0x39a   : > { %v2833_v19 = vmax.f32 %v2831_v8, 0.0 }
 0x39b   : > { %v2832_v52 = vmax.f32 %v2830_v53, 0.0  ;;  %v4172_v53 = vld [vmem:[%s7085_s4 + $0x4] ss:$0 sm:$0xff] }
 0x39c   : > { %v2997_v54 = vrot.slane %v2833_v19, 2 }
 0x39d   : > { %v2845_v22 = vrot.slane %v2832_v52, 1  ;;  %v2996_v14 = vrot.slane %v2832_v52, 2 }
 0x39f   : > { %5013 = vmatmul.mubr.msk.f32.vlgmr.msra.gmra.mrb[94].mxu0 %vm1710_vm9, %v2845_v22  ;;  %v2998_v3 = vsel %vm2740_vm12, %v2996_v14, %v2997_v54  ;;  %v4184_v54 = vld [vmem:[%s7083_s2 + $0x248] sm:$0xff] }
 0x3a0   : > { %5330 = vmatpush3.bf16.msra.mxu0 %v5329_v21  ;;  %5035 = vmatmul.mubr.msk.f32.vlgmr.msra.gmra.mrb[90].mxu1 %vm1710_vm9, %v2998_v3  ;;  %v5374_v3 = vpack.c.bf16 %v4186_v1, %v4185_v28 }
 0x3a1   : > { %5331 = vmatprep.subr.bf16.mxu0 %v5510_v35  ;;  %5023 = vmatprep.mubr.msk.f32.mxu0 %vm5511_vm2, %v5512_v57 }
 0x3a2   : > { %5056 = vmatprep.mubr.msk.f32.mxu1 %vm5511_vm2, %v5512_v57  ;;  %5348 = vmatpush3.bf16.msra.mxu1 %v5347_v25  ;;  %v5377_v25 = vpack.c.bf16 %v3572_v5, %v3571_v34 }
 0x3a3   : > { %5349 = vmatprep.subr.bf16.mxu1 %v5510_v35 }
 0x3a4   : > { %5333 = vmatpush3.bf16.msra.mxu0 %v5332_v24 }
 0x3a5   : > { %5340 = vmatprep.subr.bf16.mxu0 %v5510_v35 }
 0x3a6   : > { %5351 = vmatpush3.bf16.msra.mxu1 %v5350_v36  ;;  %v5383_v36 = vpack.c.bf16 %v3576_v41, %v3575_v6 }
 0x3a7   : > { %5024 = vmatmul.mubr.msk.f32.vlgmr.msra.gmra.mrb[96].mxu0 %vm1710_vm9, %v2832_v52  ;;  %5358 = vmatprep.subr.bf16.mxu1 %v5510_v35  ;;  %v4183_v52 = vld [vmem:[%s7083_s2 + $0x240] sm:$0xff] }
 0x3a8   : > { %5045 = vmatprep.mubr.msk.f32.mxu0 %vm5511_vm2, %v5512_v57  ;;  %5342 = vmatpush3.bf16.msra.mxu0 %v5341_v17  ;;  %v5371_v22 = vpack.c.bf16 %v4184_v54, %v4183_v52  ;;  %v5380_v17 = vpack.c.bf16 %v3574_v33, %v3573_v29 }
 0x3a9   : > { %5343 = vmatprep.subr.bf16.mxu0 %v5510_v35 }
 0x3ac   : > { %5345 = vmatpush3.bf16.msra.mxu0 %v5344_v44  ;;  %v5386_v44 = vpack.c.bf16 %v3578_v10, %v3577_v9 }
 0x3ad   : > { %5352 = vmatprep.subr.bf16.mxu0 %v5510_v35 }
 0x472   : > { %v2914_v45 = vpop.f32.mrb[94].mxu0 }
 0x473   : > { %v5014_v42 = vpop.f32.mrb[95].mxu0  ;;  %v3067_v58 = vpop.f32.mrb[90].mxu1 }
 0x474   : > { %v5036_v46 = vpop.f32.mrb[91].mxu1  ;;  %v3656_v42 = vld [vmem:[%s7084_s3 + $0x48] sm:$0xff] }
 0x47a   : > { %v2986_v37 = vpop.f32.mrb[96].mxu0 }
 0x47b   : > { %v2987_v43 = vadd.f32 %v2986_v37, %v2914_v45  ;;  %v5025_v13 = vpop.f32.mrb[97].mxu0  ;;  %v3655_v45 = vld [vmem:[%s7084_s3 + $0x40] sm:$0xff] }
 0x47d   : > { %v3071_v26 = vadd.f32 %v3067_v58, %v2987_v43  ;;  %v5389_v58 = vpack.c.bf16 %v3656_v42, %v3655_v45 }
 0x47f   : > { %v3077_v15 = vadd.f32 %v4156_v51, %v3071_v26 }
 0x481   : > { %v3078_v40 = vmax.f32 %v3077_v15, 0.0  ;;  %v4188_v15 = vld [vmem:[%s7085_s4 + $0x5] ss:$0 sm:$0xff] }
 0x483   : > { %v3090_v30 = vrot.slane %v3078_v40, 1  ;;  %5057 = vmatmul.mubr.msk.f32.vlgmr.msra.gmra.mrb[92].mxu1 %vm1710_vm9, %v3078_v40  ;;  %v3240_v47 = vrot.slane %v3078_v40, 2 }
 0x484   : > { %5078 = vmatprep.mubr.msk.f32.mxu1 %vm5511_vm2, %v5512_v57  ;;  %5360 = vmatpush3.bf16.msra.mxu1 %v5359_v38  ;;  %v3579_v38 = vld [vmem:[%s7085_s4 + $0x6] sm:$0x1] }
 0x485   : > { %5046 = vmatmul.mubr.msk.f32.vlgmr.msra.gmra.mrb[98].mxu0 %vm1710_vm9, %v3090_v30  ;;  %5361 = vmatprep.subr.bf16.mxu1 %v5510_v35 }
 0x486   : > { %5354 = vmatpush3.bf16.msra.mxu0 %v5353_v12  ;;  %5067 = vmatprep.mubr.msk.f32.mxu0 %vm5511_vm2, %v5512_v57 }
 0x487   : > { %5355 = vmatprep.subr.bf16.mxu0 %v5510_v35 }
 0x488   : > { %5363 = vmatpush3.bf16.msra.mxu1 %v5362_v11  ;;  %v5395_v11 = vpack.c.bf16 %v3735_v39, %v3734_v62 }
 0x489   : > { %5370 = vmatprep.subr.bf16.mxu1 %v5510_v35 }
 0x48a   : > { %5357 = vmatpush3.bf16.msra.mxu0 %v5356_v31 }
 0x48b   : > { %5364 = vmatprep.subr.bf16.mxu0 %v5510_v35 }
 0x48d   : > { %5068 = vmatmul.mubr.msk.f32.vlgmr.msra.gmra.mrb[100].mxu0 %vm1710_vm9, %v3240_v47 }
 0x48e   : > { %5089 = vmatprep.mubr.msk.f32.mxu0 %vm5511_vm2, %v5512_v57  ;;  %5366 = vmatpush3.bf16.msra.mxu0 %v5365_v63  ;;  %v3657_v63 = vld [vmem:[%s7084_s3 + $0x50] sm:$0xff] }
 0x48f   : > { %5367 = vmatprep.subr.bf16.mxu0 %v5510_v35  ;;  %v5392_v2 = vpack.c.bf16 %v3658_v0, %v3657_v63 }
 0x492   : > { %5369 = vmatpush3.bf16.msra.mxu0 %v5368_v7 }
 0x493   : > { %5376 = vmatprep.subr.bf16.mxu0 %v5510_v35 }
 0x556   : > { %v3231_v16 = vpop.f32.mrb[92].mxu1 }
 0x557   : > { %v5058_v23 = vpop.f32.mrb[93].mxu1 }
 0x558   : > { %v3159_v48 = vpop.f32.mrb[98].mxu0  ;;  %v3736_v23 = vld [vmem:[%s7084_s3 + $0x70] sm:$0xff] }
 0x559   : > { %v3232_v61 = vadd.f32 %v3231_v16, %v3159_v48  ;;  %v5047_v8 = vpop.f32.mrb[99].mxu0  ;;  %v3737_v48 = vld [vmem:[%s7084_s3 + $0x78] sm:$0xff] }
 0x55a   : > { %v3659_v8 = vld [vmem:[%s7085_s4 + $0x7] sm:$0x1] }
 0x560   : > { %v3309_v4 = vpop.f32.mrb[100].mxu0 }
 0x561   : > { %v3313_v49 = vadd.f32 %v3309_v4, %v3232_v61  ;;  %v5069_v18 = vpop.f32.mrb[101].mxu0  ;;  %v5398_v61 = vpack.c.bf16 %v3737_v48, %v3736_v23 }
 0x563   : > { %v3319_v19 = vadd.f32 %v4172_v53, %v3313_v49 }
 0x565   : > { %v3320_v21 = vmax.f32 %v3319_v19, 0.0 }
 0x567   : > { %v3332_v14 = vrot.slane %v3320_v21, 1  ;;  %5090 = vmatmul.mubr.msk.f32.vlgmr.msra.gmra.mrb[102].mxu0 %vm1710_vm9, %v3320_v21  ;;  %v3482_v24 = vrot.slane %v3320_v21, 2 }
 0x568   : > { %5119 = vmatprep.mubr.msk.f32.mxu0 %vm5511_vm2, %v5512_v57  ;;  %5378 = vmatpush3.bf16.msra.mxu0 %v5377_v25 }
 0x569   : > { %5079 = vmatmul.mubr.msk.f32.vlgmr.msra.gmra.mrb[94].mxu1 %vm1710_vm9, %v3332_v14  ;;  %5379 = vmatprep.subr.bf16.mxu0 %v5510_v35 }
 0x56a   : > { %5372 = vmatpush3.bf16.msra.mxu1 %v5371_v22  ;;  %5100 = vmatprep.mubr.msk.f32.mxu1 %vm5511_vm2, %v5512_v57 }
 0x56b   : > { %5373 = vmatprep.subr.bf16.mxu1 %v5510_v35 }
 0x56c   : > { %5381 = vmatpush3.bf16.msra.mxu0 %v5380_v17 }
 0x56d   : > { %5382 = vmatprep.subr.bf16.mxu0 %v5510_v35 }
 0x56e   : > { %5375 = vmatpush3.bf16.msra.mxu1 %v5374_v3 }
 0x56f   : > { %5388 = vmatprep.subr.bf16.mxu1 %v5510_v35 }
 0x570   : > { %5384 = vmatpush3.bf16.msra.mxu0 %v5383_v36 }
 0x571   : > { %5101 = vmatmul.mubr.msk.f32.vlgmr.msra.gmra.mrb[96].mxu1 %vm1710_vm9, %v3482_v24  ;;  %5385 = vmatprep.subr.bf16.mxu0 %v5510_v35 }
 0x572   : > { %5130 = vmatprep.mubr.msk.f32.mxu1 %vm5511_vm2, %v5512_v57  ;;  %5390 = vmatpush3.bf16.msra.mxu1 %v5389_v58 }
 0x573   : > { %5391 = vmatprep.subr.bf16.mxu1 %v5510_v35 }
 0x574   : > { %5387 = vmatpush3.bf16.msra.mxu0 %v5386_v44 }
 0x576   : > { %5393 = vmatpush3.bf16.msra.mxu1 %v5392_v2 }
 0x577   : > { %5394 = vmatprep.subr.bf16.mxu1 %v5510_v35 }
 0x63a   : > { %v3473_v46 = vpop.f32.mrb[102].mxu0 }
 0x63b   : > { %v5091_v37 = vpop.f32.mrb[103].mxu0 }
 0x63c   : > { %v3401_v43 = vpop.f32.mrb[94].mxu1 }
 0x63d   : > { %v3474_v13 = vadd.f32 %v3473_v46, %v3401_v43  ;;  %v5080_v51 = vpop.f32.mrb[95].mxu1 }
 0x644   : > { %v3551_v26 = vpop.f32.mrb[96].mxu1 }
 0x645   : > { %v3555_v50 = vadd.f32 %v3551_v26, %v3474_v13  ;;  %v5102_v27 = vpop.f32.mrb[97].mxu1 }
 0x647   : > { %v3561_v40 = vadd.f32 %v4188_v15, %v3555_v50 }
 0x649   : > { %v3562_v12 = vmax.f32 %v3561_v40, 0.0 }
 0x64b   : > { %v3564_v30 = vsel %vm3563_vm13, %v3562_v12, -inf }
 0x64c   : > { %v3565_v59 = vrot.slane %v3564_v30, 4 }
 0x64e   : > { %v3566_v32 = vmax.f32 %v3564_v30, %v3565_v59 }
 0x650   : > { %v3567_v31 = vrot.slane %v3566_v32, 2 }
 0x652   : > { %v3568_v47 = vmax.f32 %v3566_v32, %v3567_v31 }
 0x654   : > { %v3569_v56 = vrot.slane %v3568_v47, 1 }
 0x656   : > { %v3570_v60 = vmax.f32 %v3568_v47, %v3569_v56 }
 0x658   : > { %5120 = vmatmul.mubr.msk.f32.vlgmr.msra.gmra.mrb[104].mxu0 %vm3580_vm14, %v3570_v60 }
 0x72b   : > { %v3650_v7 = vpop.f32.mrb[104].mxu0 }
 0x72c   : > { %v3651_v20 = vadd.f32 %v3650_v7, %v3579_v38  ;;  %v5121_v55 = vpop.f32.mrb[105].mxu0 }
 0x72e   : > { %v3654_v16 = vmax.f32 %v3651_v20, 0.0 }
 0x730   : > { %5131 = vmatmul.mubr.msk.f32.vlgmr.msra.gmra.mrb[98].mxu1 %vm1710_vm9, %v3654_v16 }
 0x731   : > { %5396 = vmatpush3.bf16.msra.mxu1 %v5395_v11  ;;  %5141 = vmatprep.mubr.msk.f32.mxu1 %vm5511_vm2, %v5512_v57 }
 0x732   : > { %5397 = vmatprep.subr.bf16.mxu1 %v5510_v35  ;;  %v3738_v35 = vld [vmem:[%s7085_s4 + $0x8] sm:$0x1] }
 0x735   : > { %5399 = vmatpush3.bf16.msra.mxu1 %v5398_v61 }
 0x803   : > { %v3729_v4 = vpop.f32.mrb[98].mxu1 }
 0x804   : > { %v3730_v53 = vadd.f32 %v3729_v4, %v3659_v8  ;;  %v5132_v49 = vpop.f32.mrb[99].mxu1 }
 0x806   : > { %v3733_v57 = vmax.f32 %v3730_v53, 0.0 }
 0x808   : > { %5142 = vmatmul.mubr.msk.f32.vlgmr.msra.gmra.mrb[100].mxu1 %vm1710_vm9, %v3733_v57 }
 0x8db   : > { %v3808_v18 = vpop.f32.mrb[100].mxu1 }
 0x8dc   : > { %v3809_v19 = vadd.f32 %v3808_v18, %v3738_v35  ;;  %v5143_v52 = vpop.f32.mrb[101].mxu1 }
 0x8de   : > { %3813 = vst.msk [vmem:[%s216_s7] sm:$0x1] %vm3812_vm15, %v3809_v19 }
 0x8df   : > { %5459 = shalt.err (!%p5456_p3)
}
 0x8e0   : > { %s5460_s16 = scalar_lea.hbm %s7039_s11, 16  ;;  %s5464_s25 = scalar_lea.hbm %s7086_s5, 32 }
 0x8e1   : > { %p5461_p4 = scmp.ne.s32.totalorder %s7039_s11, %s5460_s16  ;;  %p5465_p9 = scmp.lt.u32.totalorder %s7039_s11, %s7086_s5 }
 0x8e2   : > { %p5466_p10 = scmp.lt.u32.totalorder %s5464_s25, %s5460_s16  ;;  %p5468_p12 = scmp.lt.u32.totalorder %s5460_s16, %s7039_s11 }
 0x8e3   : > { %p5462_p7 = pnand %p5461_p4, %p5582_p5 }
 0x8e4   : > { %p5467_p11 = por %p5466_p10, %p5465_p9 }
 0x8e5   : > { %p5463_p8 = pneg %p5462_p7 }
 0x8e6   : > { %p5469_p13 = por %p5468_p12, %p5467_p11 }
 0x8e8   : > { %p5470_p0 = pnand %p5469_p13, %p5463_p8 }
 0x8ea   : > { %5473 = shalt.err (!%p5470_p0)
}
 0x8eb   : > { %5404 = dma.vmem_to_hbm [thread:$0]  (%p5582_p5), %s7041_s8, 16, %s7039_s11, %s3815_s12  }
 0x8ec PF: > { %p5410_p1 = scmp.ge.s32.totalorder %s5508_s21, 2  ;;  %s3839_s6 = sand.u32 1, %s5496_s18  }
 0x8ed   : > { %s3840_s7 = scalar_lea.sflag [#allocation4], %s3839_s6 }
 0x8ee   : > { %p5407_p2 = pnand %p5410_p1, %p5586_p6 }
 0x8f0   : > { %5491 = dma.done.wait (!%p5407_p2), %s3840_s7, 16  }
 0x8f1   : > { %5493 = vsyncadd (!%p5407_p2), %s3840_s7, 4294967280  ;;  %p15_p3 = scmp.ge.s32.totalorder %s5569_s24, 4   ;;  %s7089_s18 = smov %s5500_s19 }
 0x8f2   : > { %s7090_s19 = smov %s5504_s20  ;;  %s7091_s20 = smov %s5580_s27 }
 0x8f3   : > { %s7092_s21 = smov %s5569_s24  ;;  %17 = sbr.rel (!%p15_p3) target bundleno = 3 (0x3), region = 113 }
 0x8fa   :  { %3844 = vsyncpa [#allocation4], 1 }
 0x8fb   :  { %3846 = vsyncpa [#allocation4 + $0x1], 1 }

</bundles_post_ra>
